<compile_context>
chip_gen: v5e
topology: v5e:2x2
jax: 0.10.0
libtpu: 0.0.40
codegen_flags: <defaults>
</compile_context>

<pallas_src>
import functools

import jax
import jax.numpy as jnp
from jax import lax
from jax.experimental import pallas as pl
from jax.experimental.pallas import tpu as pltpu

_NEG_BIG = -1e30  # Python float (literal, not a captured array constant)


def _layer_norm(x, w, b, eps=1e-5):
    # f32 elementwise math (x: (T, E); w, b: (1, E))
    mu = jnp.mean(x, axis=-1, keepdims=True)
    xc = x - mu
    var = jnp.mean(xc * xc, axis=-1, keepdims=True)
    return xc * lax.rsqrt(var + eps) * w + b


# ----------------------------------------------------------------------------
# Pass 1: ln_1 + QKV projection, emitted head-major (B, H, S, Dh) in bf16
# ----------------------------------------------------------------------------
def _ln_qkv_kernel(x_ref, ln1_w_ref, ln1_b_ref, w_qkv_ref, b_qkv_ref,
                   q_ref, k_ref, v_ref, *, num_heads, head_dim):
    E = x_ref.shape[-1]
    x = x_ref[...]                                                 # (TS, E) f32
    h = _layer_norm(x, ln1_w_ref[...], ln1_b_ref[...]).astype(jnp.bfloat16)
    qkv = jnp.dot(h, w_qkv_ref[...],
                  preferred_element_type=jnp.float32) + b_qkv_ref[...]
    qkv = qkv.astype(jnp.bfloat16)                                 # (TS, 3E)
    # Split heads once here (per-token cost) so pass 2 never lane-slices heads.
    for hh in range(num_heads):
        lo = hh * head_dim
        q_ref[hh] = qkv[:, lo:lo + head_dim]
        k_ref[hh] = qkv[:, E + lo:E + lo + head_dim]
        v_ref[hh] = qkv[:, 2 * E + lo:2 * E + lo + head_dim]


# ----------------------------------------------------------------------------
# Pass 2: flash attention + attn proj + residual + ln_2 + chunked MLP + residual
# ----------------------------------------------------------------------------
def _attn_mlp_kernel(
    x_ref, q_ref, k_ref, v_ref,
    w_ap_ref, b_ap_ref, ln2_w_ref, ln2_b_ref,
    w_fc_ref, b_fc_ref, w_pr_ref, b_pr_ref,
    o_ref,
    m_sc, l_sc, acc_sc, cat_sc,
    *, num_heads, head_dim, mlp_chunk,
):
    qi = pl.program_id(1)
    ki = pl.program_id(2)
    nk = pl.num_programs(2)
    TQ = q_ref.shape[1]
    TK = k_ref.shape[1]
    scale = float(head_dim) ** -0.5

    @pl.when(ki == 0)
    def _init():
        m_sc[...] = jnp.full_like(m_sc, _NEG_BIG)
        l_sc[...] = jnp.zeros_like(l_sc)
        acc_sc[...] = jnp.zeros_like(acc_sc)

    # Tile classification w.r.t. the causal diagonal.
    needs_work = ki * TK <= qi * TQ + (TQ - 1)        # not fully above diagonal
    full_tile = ki * TK + (TK - 1) <= qi * TQ         # fully below -> no mask

    def _update(masked):
        q = q_ref[...]                                             # (H, TQ, Dh) bf16
        k = k_ref[...]                                             # (H, TK, Dh) bf16
        v = v_ref[...]                                             # (H, TK, Dh) bf16
        s = jnp.einsum("hqd,hkd->hqk", q, k,
                       preferred_element_type=jnp.float32) * scale
        if masked:
            row = qi * TQ + lax.broadcasted_iota(jnp.int32, (TQ, TK), 0)
            col = ki * TK + lax.broadcasted_iota(jnp.int32, (TQ, TK), 1)
            s = jnp.where((col <= row)[None, :, :], s, _NEG_BIG)
        m_prev = m_sc[...]                                         # (H, TQ, 1)
        m_new = jnp.maximum(m_prev, jnp.max(s, axis=-1, keepdims=True))
        alpha = jnp.exp(m_prev - m_new)
        p = jnp.exp(s - m_new)                                     # f32
        l_sc[...] = alpha * l_sc[...] + jnp.sum(p, axis=-1, keepdims=True)
        pv = jnp.einsum("hqk,hkd->hqd", p.astype(v.dtype), v,
                        preferred_element_type=jnp.float32)
        acc_sc[...] = alpha * acc_sc[...] + pv
        m_sc[...] = m_new

    @pl.when(jnp.logical_and(needs_work, full_tile))
    def _unmasked():
        _update(masked=False)

    @pl.when(jnp.logical_and(needs_work, jnp.logical_not(full_tile)))
    def _masked():
        _update(masked=True)

    @pl.when(ki == nk - 1)
    def _finalize():
        # Normalize and concat heads into a lane-dense (TQ, E) bf16 scratch, then a
        # single full-depth (TQ,E)@(E,E) output projection.
        attn = acc_sc[...] * pl.reciprocal(l_sc[...], approx=True)  # (H, TQ, Dh) f32
        for hh in range(num_heads):
            lo = hh * head_dim
            cat_sc[:, lo:lo + head_dim] = attn[hh].astype(jnp.bfloat16)
        x = x_ref[...]                                              # (TQ, E) f32
        x1 = x + b_ap_ref[...] + jnp.dot(cat_sc[...], w_ap_ref[...],
                                         preferred_element_type=jnp.float32)
        # MLP sub-block with chunked intermediate (never materializes (TQ, 4E)).
        h2 = _layer_norm(x1, ln2_w_ref[...], ln2_b_ref[...]).astype(jnp.bfloat16)
        out = x1 + b_pr_ref[...]
        inter = w_fc_ref.shape[1]
        for cs in range(0, inter, mlp_chunk):
            hid = jnp.dot(h2, w_fc_ref[:, cs:cs + mlp_chunk],
                          preferred_element_type=jnp.float32) \
                  + b_fc_ref[:, cs:cs + mlp_chunk]
            hid = jax.nn.gelu(hid, approximate=False)               # nn.GELU default
            out = out + jnp.dot(hid.astype(jnp.bfloat16),
                                w_pr_ref[cs:cs + mlp_chunk, :],
                                preferred_element_type=jnp.float32)
        o_ref[...] = out


# ----------------------------------------------------------------------------
# Wrapper
# ----------------------------------------------------------------------------
def _const_spec(shape):
    zero = (0,) * len(shape)
    return pl.BlockSpec(shape, lambda *_: zero)   # resident, never re-fetched


def _pick_tile(s, target):
    if s <= target:
        return s
    for t in range(min(target, s), 7, -8):
        if s % t == 0:
            return t
    for t in range(min(target, s), 0, -1):        # graceful fallback
        if s % t == 0:
            return t
    return s


def _pick_mlp_chunk(inter):
    for c in (1024, 512, 256):
        if inter > c and inter % c == 0:
            return c
    return inter


def _vmem_limit_bytes():
    # ~75% of physical VMEM (96 MiB on v5e/v6e, 48 MiB on v7x), capped at 100 MiB.
    try:
        cap = pltpu.get_tpu_info().vmem_capacity_bytes
    except Exception:
        cap = 64 * 1024 * 1024
    return int(min(cap * 3 // 4, 100 * 1024 * 1024))


def gpt2_block(x, params, *, num_heads, q_tile=256, kv_tile=256):
    """x: (B, S, E) float32.  params: dict of f32 weights (see init_params)."""
    B, S, E = x.shape
    assert E % num_heads == 0
    head_dim = E // num_heads
    inter = params["w_fc"].shape[1]

    TQ = _pick_tile(S, q_tile)
    TK = _pick_tile(S, kv_tile)
    mlp_chunk = _pick_mlp_chunk(inter)
    vmem_limit = _vmem_limit_bytes()
    bf16 = jnp.bfloat16

    # Matmul weights as bf16 operands (f32 accumulation in-kernel); LN params and
    # biases stay f32.
    w_qkv = params["w_qkv"].astype(bf16)
    w_ap = params["w_attn_proj"].astype(bf16)
    w_fc = params["w_fc"].astype(bf16)
    w_pr = params["w_mlp_proj"].astype(bf16)

    # ---- pass 1: ln_1 + QKV projection, head-major outputs ------------------
    qkv_weights = [params["ln1_w"], params["ln1_b"], w_qkv, params["b_qkv"]]
    kernel1 = functools.partial(_ln_qkv_kernel, num_heads=num_heads,
                                head_dim=head_dim)
    q, k, v = pl.pallas_call(
        kernel1,
        out_shape=tuple(jax.ShapeDtypeStruct((B, num_heads, S, head_dim), bf16)
                        for _ in range(3)),
        grid=(B, S // TQ),
        in_specs=[pl.BlockSpec((None, TQ, E), lambda b, si: (b, si, 0))]
                 + [_const_spec(p.shape) for p in qkv_weights],
        out_specs=[pl.BlockSpec((None, num_heads, TQ, head_dim),
                                lambda b, si: (b, 0, si, 0))] * 3,
        compiler_params=pltpu.CompilerParams(
            dimension_semantics=("parallel", "parallel"),
            vmem_limit_bytes=vmem_limit),
    )(x, *qkv_weights)

    # ---- pass 2: flash attention + residual + ln_2 + MLP + residual ---------
    weights2 = [w_ap, params["b_attn_proj"], params["ln2_w"], params["ln2_b"],
                w_fc, params["b_fc"], w_pr, params["b_mlp_proj"]]
    kernel2 = functools.partial(_attn_mlp_kernel, num_heads=num_heads,
                                head_dim=head_dim, mlp_chunk=mlp_chunk)

    def kv_index_map(b, qi, ki):
        # Clamp fully-masked (above-diagonal) tiles to the last tile that actually
        # intersects the causal region: Pallas sees an unchanged block index and
        # skips the K/V DMA for tiles the kernel's pl.when skips anyway.
        last_needed = (qi * TQ + (TQ - 1)) // TK
        return (b, 0, jnp.minimum(ki, last_needed), 0)

    in_specs = [
        pl.BlockSpec((None, TQ, E), lambda b, qi, ki: (b, qi, 0)),            # x
        pl.BlockSpec((None, num_heads, TQ, head_dim),
                     lambda b, qi, ki: (b, 0, qi, 0)),                        # q
        pl.BlockSpec((None, num_heads, TK, head_dim), kv_index_map),          # k
        pl.BlockSpec((None, num_heads, TK, head_dim), kv_index_map),          # v
    ] + [_const_spec(p.shape) for p in weights2]

    return pl.pallas_call(
        kernel2,
        out_shape=jax.ShapeDtypeStruct((B, S, E), jnp.float32),
        grid=(B, S // TQ, S // TK),
        in_specs=in_specs,
        out_specs=pl.BlockSpec((None, TQ, E), lambda b, qi, ki: (b, qi, 0)),
        scratch_shapes=[
            pltpu.VMEM((num_heads, TQ, 1), jnp.float32),          # running max m
            pltpu.VMEM((num_heads, TQ, 1), jnp.float32),          # running denom l
            pltpu.VMEM((num_heads, TQ, head_dim), jnp.float32),   # output acc
            pltpu.VMEM((TQ, E), bf16),                            # head concat
        ],
        compiler_params=pltpu.CompilerParams(
            dimension_semantics=("parallel", "parallel", "arbitrary"),
            vmem_limit_bytes=vmem_limit),
    )(x, q, k, v, *weights2)


# ----------------------------------------------------------------------------
# Parameters and pure-JAX reference
# ----------------------------------------------------------------------------
def init_params(key, hidden):
    """Deterministic synthetic parameter init (shapes follow GPT2Block.__init__)."""
    ks = jax.random.split(key, 8)
    std = 0.02
    f32 = jnp.float32
    inter = 4 * hidden
    return {
        "ln1_w": jnp.ones((1, hidden), f32),
        "ln1_b": jnp.zeros((1, hidden), f32),
        "ln2_w": jnp.ones((1, hidden), f32),
        "ln2_b": jnp.zeros((1, hidden), f32),
        "w_qkv": jax.random.normal(ks[0], (hidden, 3 * hidden), f32) * std,
        "b_qkv": jax.random.normal(ks[1], (1, 3 * hidden), f32) * std,
        "w_attn_proj": jax.random.normal(ks[2], (hidden, hidden), f32) * std,
        "b_attn_proj": jax.random.normal(ks[3], (1, hidden), f32) * std,
        "w_fc": jax.random.normal(ks[4], (hidden, inter), f32) * std,
        "b_fc": jax.random.normal(ks[5], (1, inter), f32) * std,
        "w_mlp_proj": jax.random.normal(ks[6], (inter, hidden), f32) * std,
        "b_mlp_proj": jax.random.normal(ks[7], (1, hidden), f32) * std,
    }


def gpt2_block_ref(x, params, *, num_heads):
    """Pure-JAX f32 reference for correctness checking."""
    B, S, E = x.shape
    Dh = E // num_heads

    def ln(v, w, b, eps=1e-5):
        mu = jnp.mean(v, -1, keepdims=True)
        var = jnp.mean((v - mu) ** 2, -1, keepdims=True)
        return (v - mu) / jnp.sqrt(var + eps) * w + b

    h = ln(x, params["ln1_w"], params["ln1_b"])
    qkv = h @ params["w_qkv"] + params["b_qkv"]
    q, k, v = jnp.split(qkv, 3, axis=-1)
    q = q.reshape(B, S, num_heads, Dh).transpose(0, 2, 1, 3)
    k = k.reshape(B, S, num_heads, Dh).transpose(0, 2, 1, 3)
    v = v.reshape(B, S, num_heads, Dh).transpose(0, 2, 1, 3)
    s = jnp.einsum("bhqd,bhkd->bhqk", q, k) * (Dh ** -0.5)
    mask = jnp.tril(jnp.ones((S, S), bool))
    s = jnp.where(mask, s, -jnp.inf)
    p = jax.nn.softmax(s, axis=-1)
    a = jnp.einsum("bhqk,bhkd->bhqd", p, v).transpose(0, 2, 1, 3).reshape(B, S, E)
    x = x + (a @ params["w_attn_proj"] + params["b_attn_proj"])

    h2 = ln(x, params["ln2_w"], params["ln2_b"])
    hid = jax.nn.gelu(h2 @ params["w_fc"] + params["b_fc"], approximate=False)
    return x + (hid @ params["w_mlp_proj"] + params["b_mlp_proj"])


if __name__ == "__main__":
    # Small GPT2-like config; tiles chosen so the flash/KV loop, causal masked and
    # unmasked tile paths, the DMA-clamp path, and MLP chunking are all exercised
    # (2x2 seq tiles, 2 MLP chunks).
    B, S, E, H = 2, 256, 128, 2

    key = jax.random.PRNGKey(0)
    k_x, k_p = jax.random.split(key)
    x = jax.random.normal(k_x, (B, S, E), jnp.float32)
    params = init_params(k_p, E)

    out = gpt2_block(x, params, num_heads=H, q_tile=128, kv_tile=128)
    out = jax.block_until_ready(out)

    ref = gpt2_block_ref(x, params, num_heads=H)
    assert out.shape == (B, S, E)
    max_err = jnp.max(jnp.abs(out - ref))
    # bf16 matmul operands with f32 accumulation + approx reciprocal -> loosened
    # tolerance vs f32 reference.
    assert jnp.allclose(out, ref, atol=2e-2, rtol=2e-2), f"mismatch: {max_err}"

    print("KERNEL_OK")
</pallas_src>

<mosaic_0001>
module attributes {stable_mosaic.version = 11 : i64} {
  func.func @_ln_qkv_kernel(%arg0: i32, %arg1: i32, %arg2: memref<1x128x128xf32, #tpu.memory_space<vmem>>, %arg3: memref<1x128xf32, #tpu.memory_space<vmem>>, %arg4: memref<1x128xf32, #tpu.memory_space<vmem>>, %arg5: memref<128x384xbf16, #tpu.memory_space<vmem>>, %arg6: memref<1x384xf32, #tpu.memory_space<vmem>>, %arg7: memref<1x2x128x64xbf16, #tpu.memory_space<vmem>>, %arg8: memref<1x2x128x64xbf16, #tpu.memory_space<vmem>>, %arg9: memref<1x2x128x64xbf16, #tpu.memory_space<vmem>>) attributes {dimension_semantics = [#tpu.dimension_semantics<parallel>, #tpu.dimension_semantics<parallel>], iteration_bounds = array<i64: 2, 2>, scalar_prefetch = 0 : i64, scratch_operands = 0 : i64, tpu.core_type = #tpu.core_type<tc>, window_params = [{transform_indices = @transform_0, window_bounds = array<i64: 1, 128, 128>}, {pipeline_mode = #tpu.pipeline_mode<synchronous>, transform_indices = @transform_1, window_bounds = array<i64: 1, 128>}, {pipeline_mode = #tpu.pipeline_mode<synchronous>, transform_indices = @transform_2, window_bounds = array<i64: 1, 128>}, {pipeline_mode = #tpu.pipeline_mode<synchronous>, transform_indices = @transform_3, window_bounds = array<i64: 128, 384>}, {pipeline_mode = #tpu.pipeline_mode<synchronous>, transform_indices = @transform_4, window_bounds = array<i64: 1, 384>}, {transform_indices = @transform_5, window_bounds = array<i64: 1, 2, 128, 64>}, {transform_indices = @transform_6, window_bounds = array<i64: 1, 2, 128, 64>}, {transform_indices = @transform_7, window_bounds = array<i64: 1, 2, 128, 64>}]} {
    %c0 = arith.constant 0 : index
    %c0_0 = arith.constant 0 : index
    %c0_1 = arith.constant 0 : index
    %0 = vector.load %arg2[%c0, %c0_0, %c0_1] : memref<1x128x128xf32, #tpu.memory_space<vmem>>, vector<1x128x128xf32>
    %1 = vector.shape_cast %0 : vector<1x128x128xf32> to vector<128x128xf32>
    %c0_2 = arith.constant 0 : index
    %c0_3 = arith.constant 0 : index
    %2 = vector.load %arg3[%c0_2, %c0_3] : memref<1x128xf32, #tpu.memory_space<vmem>>, vector<1x128xf32>
    %c0_4 = arith.constant 0 : index
    %c0_5 = arith.constant 0 : index
    %3 = vector.load %arg4[%c0_4, %c0_5] : memref<1x128xf32, #tpu.memory_space<vmem>>, vector<1x128xf32>
    %cst = arith.constant dense<0.000000e+00> : vector<128xf32>
    %4 = vector.multi_reduction <add>, %1, %cst [1] : vector<128x128xf32> to vector<128xf32>
    %5 = vector.shape_cast %4 : vector<128xf32> to vector<128x1xf32>
    %cst_6 = arith.constant 1.280000e+02 : f32
    %6 = vector.broadcast %cst_6 : f32 to vector<128x1xf32>
    %7 = arith.divf %5, %6 : vector<128x1xf32>
    %8 = vector.broadcast %7 : vector<128x1xf32> to vector<128x128xf32>
    %9 = arith.subf %1, %8 : vector<128x128xf32>
    %10 = arith.mulf %9, %9 : vector<128x128xf32>
    %cst_7 = arith.constant dense<0.000000e+00> : vector<128xf32>
    %11 = vector.multi_reduction <add>, %10, %cst_7 [1] : vector<128x128xf32> to vector<128xf32>
    %12 = vector.shape_cast %11 : vector<128xf32> to vector<128x1xf32>
    %cst_8 = arith.constant 1.280000e+02 : f32
    %13 = vector.broadcast %cst_8 : f32 to vector<128x1xf32>
    %14 = arith.divf %12, %13 : vector<128x1xf32>
    %cst_9 = arith.constant 9.99999974E-6 : f32
    %15 = vector.broadcast %cst_9 : f32 to vector<128x1xf32>
    %16 = arith.addf %14, %15 : vector<128x1xf32>
    %17 = math.rsqrt %16 : vector<128x1xf32>
    %18 = vector.broadcast %17 : vector<128x1xf32> to vector<128x128xf32>
    %19 = arith.mulf %9, %18 : vector<128x128xf32>
    %20 = vector.broadcast %2 : vector<1x128xf32> to vector<128x128xf32>
    %21 = arith.mulf %19, %20 : vector<128x128xf32>
    %22 = vector.broadcast %3 : vector<1x128xf32> to vector<128x128xf32>
    %23 = arith.addf %21, %22 : vector<128x128xf32>
    %24 = arith.truncf %23 : vector<128x128xf32> to vector<128x128xbf16>
    %c0_10 = arith.constant 0 : index
    %c0_11 = arith.constant 0 : index
    %25 = vector.load %arg5[%c0_10, %c0_11] : memref<128x384xbf16, #tpu.memory_space<vmem>>, vector<128x384xbf16>
    %cst_12 = arith.constant dense<0.000000e+00> : vector<128x384xf32>
    %26 = tpu.matmul %24, %25, %cst_12 {dimension_numbers = #tpu.dot_dimension_numbers<[1], [0], [0], [1], [0, 0, 1, 1], [], []>} : vector<128x128xbf16>, vector<128x384xbf16>, vector<128x384xf32> -> vector<128x384xf32>
    %c0_13 = arith.constant 0 : index
    %c0_14 = arith.constant 0 : index
    %27 = vector.load %arg6[%c0_13, %c0_14] : memref<1x384xf32, #tpu.memory_space<vmem>>, vector<1x384xf32>
    %28 = vector.broadcast %27 : vector<1x384xf32> to vector<128x384xf32>
    %29 = arith.addf %26, %28 : vector<128x384xf32>
    %30 = arith.truncf %29 : vector<128x384xf32> to vector<128x384xbf16>
    %31 = vector.extract_strided_slice %30 {offsets = [0, 0], sizes = [128, 64], strides = [1, 1]} : vector<128x384xbf16> to vector<128x64xbf16>
    %c0_15 = arith.constant 0 : index
    %c0_16 = arith.constant 0 : index
    %c0_17 = arith.constant 0 : index
    %c0_18 = arith.constant 0 : index
    %32 = vector.load %arg7[%c0_15, %c0_16, %c0_17, %c0_18] : memref<1x2x128x64xbf16, #tpu.memory_space<vmem>>, vector<1x1x128x64xbf16>
    %33 = vector.shape_cast %32 : vector<1x1x128x64xbf16> to vector<128x64xbf16>
    %34 = vector.shape_cast %31 : vector<128x64xbf16> to vector<1x1x128x64xbf16>
    tpu.vector_store %arg7[%c0_15, %c0_16, %c0_17, %c0_18], %34 {strides = array<i32>} : memref<1x2x128x64xbf16, #tpu.memory_space<vmem>>, vector<1x1x128x64xbf16>,
    %35 = vector.extract_strided_slice %30 {offsets = [0, 128], sizes = [128, 64], strides = [1, 1]} : vector<128x384xbf16> to vector<128x64xbf16>
    %c0_19 = arith.constant 0 : index
    %c0_20 = arith.constant 0 : index
    %c0_21 = arith.constant 0 : index
    %c0_22 = arith.constant 0 : index
    %36 = vector.load %arg8[%c0_19, %c0_20, %c0_21, %c0_22] : memref<1x2x128x64xbf16, #tpu.memory_space<vmem>>, vector<1x1x128x64xbf16>
    %37 = vector.shape_cast %36 : vector<1x1x128x64xbf16> to vector<128x64xbf16>
    %38 = vector.shape_cast %35 : vector<128x64xbf16> to vector<1x1x128x64xbf16>
    tpu.vector_store %arg8[%c0_19, %c0_20, %c0_21, %c0_22], %38 {strides = array<i32>} : memref<1x2x128x64xbf16, #tpu.memory_space<vmem>>, vector<1x1x128x64xbf16>,
    %39 = vector.extract_strided_slice %30 {offsets = [0, 256], sizes = [128, 64], strides = [1, 1]} : vector<128x384xbf16> to vector<128x64xbf16>
    %c0_23 = arith.constant 0 : index
    %c0_24 = arith.constant 0 : index
    %c0_25 = arith.constant 0 : index
    %c0_26 = arith.constant 0 : index
    %40 = vector.load %arg9[%c0_23, %c0_24, %c0_25, %c0_26] : memref<1x2x128x64xbf16, #tpu.memory_space<vmem>>, vector<1x1x128x64xbf16>
    %41 = vector.shape_cast %40 : vector<1x1x128x64xbf16> to vector<128x64xbf16>
    %42 = vector.shape_cast %39 : vector<128x64xbf16> to vector<1x1x128x64xbf16>
    tpu.vector_store %arg9[%c0_23, %c0_24, %c0_25, %c0_26], %42 {strides = array<i32>} : memref<1x2x128x64xbf16, #tpu.memory_space<vmem>>, vector<1x1x128x64xbf16>,
    %43 = vector.extract_strided_slice %30 {offsets = [0, 64], sizes = [128, 64], strides = [1, 1]} : vector<128x384xbf16> to vector<128x64xbf16>
    %c0_27 = arith.constant 0 : index
    %c1 = arith.constant 1 : index
    %c0_28 = arith.constant 0 : index
    %c0_29 = arith.constant 0 : index
    %44 = vector.load %arg7[%c0_27, %c1, %c0_28, %c0_29] : memref<1x2x128x64xbf16, #tpu.memory_space<vmem>>, vector<1x1x128x64xbf16>
    %45 = vector.shape_cast %44 : vector<1x1x128x64xbf16> to vector<128x64xbf16>
    %46 = vector.shape_cast %43 : vector<128x64xbf16> to vector<1x1x128x64xbf16>
    tpu.vector_store %arg7[%c0_27, %c1, %c0_28, %c0_29], %46 {strides = array<i32>} : memref<1x2x128x64xbf16, #tpu.memory_space<vmem>>, vector<1x1x128x64xbf16>,
    %47 = vector.extract_strided_slice %30 {offsets = [0, 192], sizes = [128, 64], strides = [1, 1]} : vector<128x384xbf16> to vector<128x64xbf16>
    %c0_30 = arith.constant 0 : index
    %c1_31 = arith.constant 1 : index
    %c0_32 = arith.constant 0 : index
    %c0_33 = arith.constant 0 : index
    %48 = vector.load %arg8[%c0_30, %c1_31, %c0_32, %c0_33] : memref<1x2x128x64xbf16, #tpu.memory_space<vmem>>, vector<1x1x128x64xbf16>
    %49 = vector.shape_cast %48 : vector<1x1x128x64xbf16> to vector<128x64xbf16>
    %50 = vector.shape_cast %47 : vector<128x64xbf16> to vector<1x1x128x64xbf16>
    tpu.vector_store %arg8[%c0_30, %c1_31, %c0_32, %c0_33], %50 {strides = array<i32>} : memref<1x2x128x64xbf16, #tpu.memory_space<vmem>>, vector<1x1x128x64xbf16>,
    %51 = vector.extract_strided_slice %30 {offsets = [0, 320], sizes = [128, 64], strides = [1, 1]} : vector<128x384xbf16> to vector<128x64xbf16>
    %c0_34 = arith.constant 0 : index
    %c1_35 = arith.constant 1 : index
    %c0_36 = arith.constant 0 : index
    %c0_37 = arith.constant 0 : index
    %52 = vector.load %arg9[%c0_34, %c1_35, %c0_36, %c0_37] : memref<1x2x128x64xbf16, #tpu.memory_space<vmem>>, vector<1x1x128x64xbf16>
    %53 = vector.shape_cast %52 : vector<1x1x128x64xbf16> to vector<128x64xbf16>
    %54 = vector.shape_cast %51 : vector<128x64xbf16> to vector<1x1x128x64xbf16>
    tpu.vector_store %arg9[%c0_34, %c1_35, %c0_36, %c0_37], %54 {strides = array<i32>} : memref<1x2x128x64xbf16, #tpu.memory_space<vmem>>, vector<1x1x128x64xbf16>,
    return
  }
  func.func @transform_0(%arg0: i32, %arg1: i32) -> (i32, i32, i32) {
    %c0_i32 = arith.constant 0 : i32
    %c0_i32_0 = arith.constant 0 : i32
    return %arg0, %arg1, %c0_i32 : i32, i32, i32
  }
  func.func @transform_1(%arg0: i32, %arg1: i32) -> (i32, i32) {
    %c0_i32 = arith.constant 0 : i32
    %c0_i32_0 = arith.constant 0 : i32
    %c0_i32_1 = arith.constant 0 : i32
    return %c0_i32, %c0_i32_0 : i32, i32
  }
  func.func @transform_2(%arg0: i32, %arg1: i32) -> (i32, i32) {
    %c0_i32 = arith.constant 0 : i32
    %c0_i32_0 = arith.constant 0 : i32
    %c0_i32_1 = arith.constant 0 : i32
    return %c0_i32, %c0_i32_0 : i32, i32
  }
  func.func @transform_3(%arg0: i32, %arg1: i32) -> (i32, i32) {
    %c0_i32 = arith.constant 0 : i32
    %c0_i32_0 = arith.constant 0 : i32
    %c0_i32_1 = arith.constant 0 : i32
    return %c0_i32, %c0_i32_0 : i32, i32
  }
  func.func @transform_4(%arg0: i32, %arg1: i32) -> (i32, i32) {
    %c0_i32 = arith.constant 0 : i32
    %c0_i32_0 = arith.constant 0 : i32
    %c0_i32_1 = arith.constant 0 : i32
    return %c0_i32, %c0_i32_0 : i32, i32
  }
  func.func @transform_5(%arg0: i32, %arg1: i32) -> (i32, i32, i32, i32) {
    %c0_i32 = arith.constant 0 : i32
    %c0_i32_0 = arith.constant 0 : i32
    %c0_i32_1 = arith.constant 0 : i32
    return %arg0, %c0_i32, %arg1, %c0_i32_0 : i32, i32, i32, i32
  }
  func.func @transform_6(%arg0: i32, %arg1: i32) -> (i32, i32, i32, i32) {
    %c0_i32 = arith.constant 0 : i32
    %c0_i32_0 = arith.constant 0 : i32
    %c0_i32_1 = arith.constant 0 : i32
    return %arg0, %c0_i32, %arg1, %c0_i32_0 : i32, i32, i32, i32
  }
  func.func @transform_7(%arg0: i32, %arg1: i32) -> (i32, i32, i32, i32) {
    %c0_i32 = arith.constant 0 : i32
    %c0_i32_0 = arith.constant 0 : i32
    %c0_i32_1 = arith.constant 0 : i32
    return %arg0, %c0_i32, %arg1, %c0_i32_0 : i32, i32, i32, i32
  }
}

</mosaic_0001>

<bundles_post_ra>
// kernel: tpu_custom_call.1
= control target key start
LH: loop header
LB: loop body
LE: loop exit
PB: predicated region body
PF: predicated region fallthrough
CT: control target
= control target key end

     0   :  { %s3712_s0 = inlined_call_operand.hbm [shape: f32[2,256,128], index: 0, kind: input, shape index: {}]   ;;  %s3713_s1 = inlined_call_operand.hbm [shape: f32[1,128], index: 1, kind: input, shape index: {}]   ;;  %s3714_s2 = inlined_call_operand.hbm [shape: f32[1,128], index: 2, kind: input, shape index: {}]   ;;  %s3715_s3 = inlined_call_operand.hbm [shape: bf16[128,384], index: 3, kind: input, shape index: {}]   ;;  %s3716_s4 = inlined_call_operand.vmem [shape: f32[1,384], index: 4, kind: input, shape index: {}]   ;;  %s3717_s5 = inlined_call_operand.vmem [shape: bf16[2,2,256,64], index: 5, kind: output, shape index: {0}]   ;;  %s3718_s6 = inlined_call_operand.vmem [shape: bf16[2,2,256,64], index: 6, kind: output, shape index: {1}]   ;;  %s3719_s7 = inlined_call_operand.vmem [shape: bf16[2,2,256,64], index: 7, kind: output, shape index: {2}]  }
   0x1   :  { %3721 = sst [smem:[#allocation17_spill]] %s3713_s1 }
   0x2   :  { %3722 = sst [smem:[#allocation18_spill]] %s3714_s2 }
   0x3   :  { %3723 = sst [smem:[#allocation19_spill]] %s3715_s3 }
   0x4   :  { %3724 = sst [smem:[#allocation20_spill]] %s3717_s5 }
   0x5   :  { %3725 = sst [smem:[#allocation21_spill]] %s3718_s6 }
   0x6   :  { %3726 = sst [smem:[#allocation22_spill]] %s3719_s7 }
   0x7   :  { %13 = vsyncpa [#allocation3], 0 }
   0x8   :  { %15 = vsyncpa [#allocation3 + $0x1], 0 }
   0x9   :  { %16 = vsyncpa [#allocation5], 0 }
   0xa   :  { %17 = vsyncpa [#allocation8], 0  ;;  %s2725_s24 = smov 0   ;;  %s2727_s25 = smov 0  }
   0xb   :  { %s2729_s26 = smov 0   ;;  %s2731_s27 = smov 0  }
   0xc   :  { %s2733_s28 = smov 0   ;;  %s2735_s29 = smov 0  }
   0xd   :  { %s2737_s30 = smov 0   ;;  %s2739_s8 = smov 0  }
   0xe LB: > { %3727 = sst [smem:[#allocation15_spill]] %s2662_s28  ;;  %s2111_s9 = sadd.s32 4294967295, %s2674_s8   ;;  %s2674_s8 = sphi %s2739_s8, %s23_s8   ;;  %s2670_s30 = sphi %s2737_s30, %s3764_s30   ;;  %s2666_s29 = sphi %s2735_s29, %s3763_s29   ;;  %s2662_s28 = sphi %s2733_s28, %s3762_s28   ;;  %s2658_s27 = sphi %s2731_s27, %s3761_s27   ;;  %s2654_s26 = sphi %s2729_s26, %s3760_s26   ;;  %s2650_s25 = sphi %s2727_s25, %s3759_s25   ;;  %s2646_s24 = sphi %s2725_s24, %s3758_s24  }
   0xf   : > { %p57_p0 = scmp.ne.s32.totalorder %s2650_s25, %s2646_s24  ;;  %p2765_p1 = scmp.eq.s32.totalorder %s2111_s9, 0 }
  0x10   : > { %p2769_p2 = scmp.eq.s32.totalorder %s2111_s9, 3  ;;  %p2113_p3 = scmp.ge.s32.totalorder %s2674_s8, 1 }
  0x11   : > { %p236_p4 = scmp.lt.s32.totalorder %s2674_s8, 5  ;;  %p2777_p5 = por %p2765_p1, %p57_p0 }
  0x12   : > { %s3732_s1 = sld [smem:[#allocation17_spill]]  ;;  %s2676_s17 = smov [#allocation4]  }
  0x13   : > { %p2781_p6 = pnand %p2113_p3, %p236_p4  ;;  %s250_s18 = sshll.u32 %s2676_s17, 4  ;;  %s251_s18 = int_to_ptr.vmem [resolvable:$true] %s250_s18 }
  0x14   : > { %s3734_s2 = sld [smem:[#allocation18_spill]]  ;;  %s2677_s23 = smov [#allocation6]  }
  0x15   : > { %p2350_p7 = pneg %p2781_p6  ;;  %s262_s24 = sshll.u32 %s2677_s23, 4  ;;  %s263_s24 = int_to_ptr.vmem [resolvable:$true] %s262_s24 }
  0x16   : > { %s3735_s3 = sld [smem:[#allocation19_spill]]  ;;  %s2678_s17 = smov [#allocation7]  }
  0x17   : > { %p2792_p8 = pnand %p2350_p7, %p2765_p1  ;;  %s273_s20 = sshll.u32 %s2678_s17, 4  ;;  %s274_s20 = int_to_ptr.vmem [resolvable:$true] %s273_s20 }
  0x18   : > { %s248_s16 = sshll.u32 %s3732_s1, 4  ;;  %s2679_s21 = smov 192   ;;  %s249_s16 = int_to_ptr.hbm [resolvable:$true] %s248_s16 }
  0x19   : > { %2353 = dma.hbm_to_vmem [thread:$0]  (!%p2792_p8), %s249_s16, 16, %s251_s18, [#allocation5]  }
  0x1a   : > { %s260_s22 = sshll.u32 %s3734_s2, 4  ;;  %s2680_s23 = smov 12   ;;  %s261_s22 = int_to_ptr.hbm [resolvable:$true] %s260_s22 }
  0x1b   : > { %2356 = dma.hbm_to_vmem [thread:$0]  (!%p2792_p8), %s261_s22, 16, %s263_s24, [#allocation5]  }
  0x1c   : > { %s271_s15 = sshll.u32 %s3735_s3, 4  ;;  %s32_s16 = sadd.s32 1, %s2666_s29  ;;  %s272_s15 = int_to_ptr.hbm [resolvable:$true] %s271_s15 }
  0x1d   : > { %2359 = dma.hbm_to_vmem [thread:$0]  (!%p2792_p8), %s272_s15, 3072, %s274_s20, [#allocation8], %s2679_s21, %s2679_s21, %s2680_s23  }
  0x1e   : > { %s35_s18 = sadd.s32 1, %s2670_s30  ;;  %p33_p9 = scmp.ge.s32.totalorder %s32_s16, 2 }
  0x1f   : > { %s44_s9 = sadd.s32 1, %s2654_s26  ;;  %p51_p10 = scmp.ne.s32.totalorder %s2654_s26, %s2650_s25 }
  0x20   : > { %p52_p11 = scmp.eq.s32.totalorder %s2674_s8, 0  ;;  %s3766_s16 = smov (%p33_p9, %s32_s16), 0 }
  0x21   : > { %3736 = sst [smem:[#allocation16_spill]] %s3766_s16  ;;  %s3768_s18 = smov (!%p33_p9, %s35_s18), %s2670_s30 }
  0x22   : > { %s40_s22 = ssub.s32 %s2666_s29, %s3766_s16  ;;  %p2819_p12 = por %p52_p11, %p51_p10 }
  0x23   : > { %p37_p13 = scmp.ge.s32.totalorder %s3768_s18, 2  ;;  %p2825_p0 = por %p2769_p2, %p51_p10 }
  0x24   : > { %p2367_p3 = scmp.lt.s32.totalorder %s2674_s8, 4  ;;  %s290_s14 = sand.u32 1, %s2654_s26  }
  0x25   : > { %s3770_s18 = smov (%p37_p13, %s3768_s18), 0  ;;  %s2118_s15 = sshll.u32 %s290_s14, 7 }
  0x26   : > { %s39_s17 = ssub.s32 %s2670_s30, %s3770_s18  ;;  %s2119_s21 = sshll.u32 %s2666_s29, 4 }
  0x27   : > { %s41_s20 = sor.u32 %s40_s22, %s39_s17  ;;  %s2120_s23 = sshll.u32 %s2670_s30, 5 }
  0x28   : > { %p42_p4 = scmp.eq.s32.totalorder %s41_s20, 0  ;;  %s299_s1 = sadd.s32 %s2120_s23, %s2119_s21 }
  0x29   : > { %s294_s2 = scalar_lea.vmem [#allocation2], %s2118_s15  ;;  %s2121_s16 = sshll.u32 %s299_s1, 3 }
  0x2a   : > { %s304_s11 = sshll.u32 %s294_s2, 4  ;;  %s301_s5 = scalar_lea.hbm %s3712_s0, %s2121_s16  ;;  %s305_s11 = int_to_ptr.vmem [resolvable:$true] %s304_s11 }
  0x2b   : > { %s2838_s3 = scalar_select %p42_p4, %s2654_s26, %s44_s9  }
  0x2c   : > { %p2361_p2 = pnand %p2367_p3, %p2819_p12  ;;  %s302_s28 = sshll.u32 %s301_s5, 4  ;;  %s303_s28 = int_to_ptr.hbm [resolvable:$true] %s302_s28 }
  0x2d   : > { %s291_s22 = scalar_lea.sflag [#allocation3], %s290_s14  ;;  %s2681_s17 = smov 128  }
  0x2e   : > { %s2682_s20 = smov 8   ;;  %316 = sbr.rel (%p2781_p6) target bundleno = 818 (0x332), region = 40 }
  0x2f   : > { %2363 = dma.hbm_to_vmem [thread:$0]  (!%p2361_p2), %s303_s28, 2048, %s305_s11, %s291_s22, %s2681_s17, %s2681_s17, %s2682_s20  }
  0x30   : > { %s318_s1 = sand.u32 (!%p2781_p6), 1, %s2650_s25  }
  0x31   : > { %s2850_s2 = sshll.u32 (!%p2781_p6), %s318_s1, 7  ;;  %s319_s6 = scalar_lea.sflag (!%p2781_p6), [#allocation3], %s318_s1 }
  0x32   : > { %s2853_s7 = scalar_lea.vmem (!%p2781_p6), [#allocation2], %s2850_s2 }
  0x33   : > { %2633 = dma.done.wait (%p2777_p5), %s319_s6, 2048  }
  0x34   : > { %2635 = vsyncadd (%p2777_p5), %s319_s6, 4294965248 }
  0x35   : > { %2637 = dma.done.wait (%p2765_p1), [#allocation5], 32  }
  0x36   : > { %2639 = vsyncadd (%p2765_p1), [#allocation5], 4294967264 }
  0x37   : > { %2641 = dma.done.wait (%p2765_p1), [#allocation8], 3072  }
  0x38   : > { %2643 = vsyncadd (%p2765_p1), [#allocation8], 4294964224  ;;  %v392_v0 = vld [vmem:[%s2853_s7 + $0x60] sm:$0xff]  ;;  %v382_v2 = vld [vmem:[%s2853_s7 + $0x10] sm:$0xff]  ;;  %v2683_v10 = vmov 128.0   ;;  %s3270_s10 = scalar_lea.vmem [#allocation9], %s2850_s2 }
  0x39   : > { %v380_v1 = vld [vmem:[%s2853_s7] sm:$0xff]  ;;  %422 = vadd.xlane.f32.xlu1 %v392_v0  ;;  %402 = vadd.xlane.f32.xlu2 %v382_v2  ;;  %v393_v3 = vld [vmem:[%s2853_s7 + $0x68] sm:$0xff]  ;;  %v383_v5 = vld [vmem:[%s2853_s7 + $0x18] sm:$0xff]  ;;  %2446 = vrcp.f32 %v2683_v10  ;;  %s2684_s12 = smov 64   ;;  %s3277_s13 = scalar_lea.vmem [#allocation10], %s2850_s2 }
  0x3a   : > { %398 = vadd.xlane.f32.xlu0 %v380_v1  ;;  %v381_v4 = vld [vmem:[%s2853_s7 + $0x8] sm:$0xff]  ;;  %v394_v6 = vld [vmem:[%s2853_s7 + $0x70] sm:$0xff]  ;;  %v395_v7 = vld [vmem:[%s2853_s7 + $0x78] sm:$0xff]  ;;  %s3296_s16 = scalar_lea.vmem [#allocation11], %s2850_s2  ;;  %s3751_s9 = sld [smem:[#allocation15_spill]] (%p2825_p0) }
  0x3b   : > { %v384_v8 = vld [vmem:[%s2853_s7 + $0x20] sm:$0xff]  ;;  %v2877_v9 = vld [vmem:[%s2853_s7 + $0x28] sm:$0xff]  ;;  %v2900_v33 = vld [vmem:[%s2853_s7 + $0x38] sm:$0xff]  ;;  %s2277_s24 = sshll.u32 (%p2825_p0), %s2658_s27, 4  ;;  %s3752_s22 = sld [smem:[#allocation20_spill]] (%p2825_p0) }
  0x3c   : > { %v2917_v45 = vld [vmem:[%s2853_s7 + $0x30] sm:$0xff]  ;;  %v2932_v53 = vld [vmem:[%s2853_s7 + $0x48] sm:$0xff]  ;;  %v2944_v59 = vld [vmem:[%s2853_s7 + $0x40] sm:$0xff] }
  0x3d   : > { %v2940_v57 = vld [vmem:[%s2853_s7 + $0x50] sm:$0xff]  ;;  %v2952_v61 = vld [vmem:[%s2853_s7 + $0x58] sm:$0xff]  ;;  %v2216_v63 = vld [vmem:[#allocation7 + $0xa8] sm:$0xf] }
  0x3e   : > { %v2306_v10 = vld [vmem:[#allocation7 + $0x94] sm:$0xf] }
  0x3f   : > { %v2447_v11 = vpop.eup %2446 }
  0x40   : > { %v431_v12 = vmul.f32 128.0, %v2447_v11  ;;  %vm435_vm0 = vweird.f32 %v2447_v11  ;;  %s2278_s14 = sshll.u32 (%p2825_p0), %s3751_s9, 6 }
  0x41   : > { %424 = vadd.xlane.f32.xlu1 %v393_v3  ;;  %404 = vadd.xlane.f32.xlu2 %v383_v5  ;;  %s1427_s15 = sadd.s32 (%p2825_p0), %s2278_s14, %s2277_s24 }
  0x42   : > { %400 = vadd.xlane.f32.xlu0 %v381_v4  ;;  %v432_v13 = vsub.f32 1.0, %v431_v12  ;;  %v2206_v12 = vld [vmem:[#allocation7 + $0x9c] sm:$0xf0]  ;;  %s2279_s21 = sshll.u32 (%p2825_p0), %s1427_s15, 2 }
  0x43   : > { %s1429_s17 = scalar_lea.vmem (%p2825_p0), %s3752_s22, %s2279_s21 }
  0x44   : > { %v433_v14 = vmul.f32 %v2447_v11, %v432_v13  ;;  %v2212_v13 = vld [vmem:[#allocation7 + $0x98] sm:$0xf] }
  0x46   : > { %v434_v15 = vadd.f32 %v2447_v11, %v433_v14  ;;  %v2308_v14 = vld [vmem:[#allocation7 + $0xa0] sm:$0xf0] }
  0x48   : > { %v2880_v16 = vsel %vm435_vm0, %v2447_v11, %v434_v15  ;;  %v2963_v15 = vor.u32 %v2306_v10, %v2206_v12  ;;  %v2144_v10 = vld [vmem:[#allocation7 + $0x18] sm:$0xf]  ;;  %v2291_v12 = vld [vmem:[#allocation7 + $0x1c] sm:$0xf] }
  0x49   : > { %428 = vadd.xlane.f32.xlu1 %v395_v7  ;;  %406 = vadd.xlane.f32.xlu2 %v384_v8 }
  0x4a   : > { %426 = vadd.xlane.f32.xlu0 %v394_v6 }
  0x52   : > { %408 = vadd.xlane.f32.xlu0 %v2877_v9 }
  0xac   : > { %v423_v17 = vpop.xlane.xlu1 %422  ;;  %v403_v23 = vpop.xlane.xlu2 %402 }
  0xad   : > { %v399_v18 = vpop.xlane.xlu0 %398  ;;  %v449_v19 = vmul.f32 %v2880_v16, %v423_v17  ;;  %v439_v32 = vmul.f32 %v2880_v16, %v403_v23  ;;  %v2965_v17 = vor.u32 %v2308_v14, %v2212_v13 }
  0xae   : > { %v437_v20 = vmul.f32 %v2880_v16, %v399_v18  ;;  %v2192_v18 = vld [vmem:[#allocation7 + $0x78] sm:$0xf] }
  0xaf   : > { %v2884_v21 = vsub.f32 %v392_v0, %v449_v19  ;;  %v2907_v37 = vsub.f32 %v382_v2, %v439_v32  ;;  %v2310_v0 = vld [vmem:[#allocation7 + $0xb0] sm:$0xf0]  ;;  %v2304_v19 = vld [vmem:[#allocation7 + $0x80] sm:$0xf0]  ;;  %v2301_v32 = vld [vmem:[#allocation7 + $0x68] sm:$0xf0] }
  0xb0   : > { %v2886_v22 = vsub.f32 %v380_v1, %v437_v20  ;;  %v2309_v1 = vld [vmem:[#allocation7 + $0xac] sm:$0xf]  ;;  %v2217_v2 = vor.u32 %v2310_v0, %v2216_v63  ;;  %v2303_v20 = vld [vmem:[#allocation7 + $0x7c] sm:$0xf]  ;;  %v2193_v23 = vor.u32 %v2304_v19, %v2192_v18  ;;  %v2294_v63 = vld [vmem:[#allocation7 + $0x34] sm:$0xf] }
  0xb1   : > { %v481_v24 = vmul.f32 %v2884_v21, %v2884_v21  ;;  %v471_v42 = vmul.f32 %v2907_v37, %v2907_v37  ;;  %v2146_v19 = vld [vmem:[#allocation7 + $0x24] sm:$0xf0] }
  0xb2   : > { %v469_v25 = vmul.f32 %v2886_v22, %v2886_v22  ;;  %939 = vmatpush.bf16.msra.mxu0 %v2217_v2  ;;  %2312 = vmatpush.bf16.msra.mxu3 %v2217_v2  ;;  %v2164_v2 = vld [vmem:[#allocation7 + $0x38] sm:$0xf] }
  0xb3   : > { %509 = vadd.xlane.f32.xlu0 %v481_v24  ;;  %v2194_v24 = vld [vmem:[#allocation7 + $0x84] sm:$0xf0] }
  0xb4   : > { %485 = vadd.xlane.f32.xlu1 %v469_v25  ;;  %v425_v26 = vpop.xlane.xlu1 %424  ;;  %v405_v36 = vpop.xlane.xlu2 %404  ;;  %v2200_v25 = vld [vmem:[#allocation7 + $0x80] sm:$0xf] }
  0xb5   : > { %v401_v27 = vpop.xlane.xlu0 %400  ;;  %v450_v28 = vmul.f32 %v2880_v16, %v425_v26  ;;  %v440_v44 = vmul.f32 %v2880_v16, %v405_v36  ;;  %v2305_v26 = vld [vmem:[#allocation7 + $0x88] sm:$0xf0]  ;;  %v2182_v36 = vld [vmem:[#allocation7 + $0x6c] sm:$0xf0] }
  0xb6   : > { %v438_v29 = vmul.f32 %v2880_v16, %v401_v27  ;;  %v2969_v27 = vor.u32 %v2303_v20, %v2194_v24  ;;  %v2152_v20 = vld [vmem:[#allocation7 + $0x20] sm:$0xf]  ;;  %v2995_v24 = vor.u32 %v2291_v12, %v2146_v19 }
  0xb7   : > { %v2894_v30 = vsub.f32 %v393_v3, %v450_v28  ;;  %v2924_v48 = vsub.f32 %v383_v5, %v440_v44  ;;  %v2218_v3 = vld [vmem:[#allocation7 + $0xb4] sm:$0xf0]  ;;  %v2311_v5 = vld [vmem:[#allocation7 + $0xb8] sm:$0xf0]  ;;  %v2971_v28 = vor.u32 %v2305_v26, %v2200_v25  ;;  %v2298_v44 = vld [vmem:[#allocation7 + $0x50] sm:$0xf0] }
  0xb8   : > { %v2896_v31 = vsub.f32 %v381_v4, %v438_v29  ;;  %v2224_v4 = vld [vmem:[#allocation7 + $0xb0] sm:$0xf]  ;;  %v2180_v29 = vld [vmem:[#allocation7 + $0x60] sm:$0xf] }
  0xb9   : > { %v482_v34 = vmul.f32 %v2894_v30, %v2894_v30  ;;  %v472_v52 = vmul.f32 %v2924_v48, %v2924_v48 }
  0xba   : > { %v470_v35 = vmul.f32 %v2896_v31, %v2896_v31 }
  0xbb   : > { %412 = vadd.xlane.f32.xlu0 %v2900_v33 }
  0xbc   : > { %511 = vadd.xlane.f32.xlu1 %v482_v34  ;;  %487 = vadd.xlane.f32.xlu2 %v470_v35  ;;  %v429_v39 = vpop.xlane.xlu1 %428  ;;  %v407_v49 = vpop.xlane.xlu2 %406  ;;  %v2300_v34 = vld [vmem:[#allocation7 + $0x64] sm:$0xf]  ;;  %v2181_v35 = vor.u32 %v2301_v32, %v2180_v29  ;;  %v2132_v32 = vld [vmem:[#allocation7] sm:$0xf] }
  0xbd   : > { %v427_v38 = vpop.xlane.xlu0 %426  ;;  %v452_v43 = vmul.f32 %v2880_v16, %v429_v39  ;;  %v441_v51 = vmul.f32 %v2880_v16, %v407_v49  ;;  %v2302_v39 = vld [vmem:[#allocation7 + $0x70] sm:$0xf0] }
  0xbe   : > { %v451_v40 = vmul.f32 %v2880_v16, %v427_v38  ;;  %v2188_v38 = vld [vmem:[#allocation7 + $0x68] sm:$0xf] }
  0xbf   : > { %v2921_v47 = vsub.f32 %v395_v7, %v452_v43  ;;  %v2935_v54 = vsub.f32 %v384_v8, %v441_v51  ;;  %v2959_v7 = vor.u32 %v2311_v5, %v2224_v4  ;;  %v2204_v8 = vld [vmem:[#allocation7 + $0x90] sm:$0xf]  ;;  %v2168_v43 = vld [vmem:[#allocation7 + $0x48] sm:$0xf] }
  0xc0   : > { %v2910_v41 = vsub.f32 %v394_v6, %v451_v40  ;;  %v2957_v6 = vor.u32 %v2309_v1, %v2218_v3  ;;  %v2975_v40 = vor.u32 %v2300_v34, %v2182_v36  ;;  %v2169_v49 = vor.u32 %v2298_v44, %v2168_v43  ;;  %v2176_v51 = vld [vmem:[#allocation7 + $0x50] sm:$0xf]  ;;  %v2158_v1 = vld [vmem:[#allocation7 + $0x3c] sm:$0xf0]  ;;  %v2296_v3 = vld [vmem:[#allocation7 + $0x40] sm:$0xf0] }
  0xc1   : > { %v484_v50 = vmul.f32 %v2921_v47, %v2921_v47  ;;  %v473_v56 = vmul.f32 %v2935_v54, %v2935_v54  ;;  %1037 = vmatpush.bf16.msra.mxu2 %v2959_v7  ;;  %v2987_v4 = vor.u32 %v2294_v63, %v2158_v1  ;;  %v2989_v5 = vor.u32 %v2296_v3, %v2164_v2  ;;  %v2289_v34 = vld [vmem:[#allocation7 + $0x8] sm:$0xf0]  ;;  %v2290_v43 = vld [vmem:[#allocation7 + $0x10] sm:$0xf0] }
  0xc2   : > { %v483_v46 = vmul.f32 %v2910_v41, %v2910_v41  ;;  %988 = vmatpush.bf16.msra.mxu1 %v2957_v6  ;;  %v2133_v36 = vor.u32 %v2289_v34, %v2132_v32 }
  0xc4   : > { %489 = vadd.xlane.f32.xlu1 %v471_v42  ;;  %513 = vadd.xlane.f32.xlu0 %v483_v46  ;;  %v2977_v42 = vor.u32 %v2302_v39, %v2188_v38  ;;  %v2297_v46 = vld [vmem:[#allocation7 + $0x4c] sm:$0xf]  ;;  %v2134_v38 = vld [vmem:[#allocation7 + $0xc] sm:$0xf0]  ;;  %v2140_v39 = vld [vmem:[#allocation7 + $0x8] sm:$0xf] }
  0xc5   : > { %410 = vadd.xlane.f32.xlu2 %v2917_v45  ;;  %v409_v55 = vpop.xlane.xlu0 %408  ;;  %1038 = vmatpush.bf16.msra.mxu2 %v2965_v17 }
  0xc6   : > { %v442_v58 = vmul.f32 %v2880_v16, %v409_v55  ;;  %989 = vmatpush.bf16.msra.mxu1 %v2963_v15 }
  0xc8   : > { %v2949_v60 = vsub.f32 %v2877_v9, %v442_v58  ;;  %v2307_v9 = vld [vmem:[#allocation7 + $0x98] sm:$0xf0]  ;;  %v2156_v58 = vld [vmem:[#allocation7 + $0x30] sm:$0xf] }
  0xc9   : > { %v2205_v11 = vor.u32 %v2307_v9, %v2204_v8  ;;  %1039 = vmatpush.bf16.msra.mxu2 %v2971_v28 }
  0xca   : > { %v474_v62 = vmul.f32 %v2949_v60, %v2949_v60  ;;  %990 = vmatpush.bf16.msra.mxu1 %v2969_v27 }
  0xcb   : > { %940 = vmatpush.bf16.msra.mxu0 %v2205_v11  ;;  %2313 = vmatpush.bf16.msra.mxu3 %v2205_v11  ;;  %v2292_v11 = vld [vmem:[#allocation7 + $0x20] sm:$0xf0] }
  0xcc   : > { %515 = vadd.xlane.f32.xlu1 %v484_v50  ;;  %416 = vadd.xlane.f32.xlu0 %v2932_v53  ;;  %v2170_v50 = vld [vmem:[#allocation7 + $0x54] sm:$0xf0]  ;;  %v2145_v18 = vor.u32 %v2292_v11, %v2144_v10 }
  0xcd   : > { %491 = vadd.xlane.f32.xlu2 %v472_v52  ;;  %1040 = vmatpush.bf16.msra.mxu2 %v2977_v42  ;;  %v2299_v52 = vld [vmem:[#allocation7 + $0x58] sm:$0xf0]  ;;  %v2981_v55 = vor.u32 %v2297_v46, %v2170_v50  ;;  %v3009_v46 = vor.u32 %v2290_v43, %v2140_v39 }
  0xce   : > { %991 = vmatpush.bf16.msra.mxu1 %v2975_v40 }
  0xcf   : > { %941 = vmatpush.bf16.msra.mxu0 %v2193_v23  ;;  %2314 = vmatpush.bf16.msra.mxu3 %v2193_v23  ;;  %v2293_v23 = vld [vmem:[#allocation7 + $0x28] sm:$0xf0] }
  0xd0   : > { %v2997_v25 = vor.u32 %v2293_v23, %v2152_v20 }
  0xd2   : > { %992 = vmatpush.bf16.msra.mxu1 %v2981_v55 }
  0xd3   : > { %942 = vmatpush.bf16.msra.mxu0 %v2181_v35  ;;  %2315 = vmatpush.bf16.msra.mxu3 %v2181_v35  ;;  %v2288_v35 = vld [vmem:[#allocation7 + $0x4] sm:$0xf] }
  0xd4   : > { %493 = vadd.xlane.f32.xlu1 %v473_v56  ;;  %418 = vadd.xlane.f32.xlu0 %v2940_v57  ;;  %v2983_v56 = vor.u32 %v2299_v52, %v2176_v51  ;;  %v3007_v44 = vor.u32 %v2288_v35, %v2134_v38 }
  0xd5   : > { %414 = vadd.xlane.f32.xlu2 %v2944_v59 }
  0xd6   : > { %1041 = vmatpush.bf16.msra.mxu2 %v2983_v56  ;;  %993 = vmatpush.bf16.msra.mxu1 %v2987_v4 }
  0xd7   : > { %943 = vmatpush.bf16.msra.mxu0 %v2169_v49  ;;  %2316 = vmatpush.bf16.msra.mxu3 %v2169_v49 }
  0xda   : > { %1042 = vmatpush.bf16.msra.mxu2 %v2989_v5  ;;  %994 = vmatpush.bf16.msra.mxu1 %v2995_v24 }
  0xdc   : > { %420 = vadd.xlane.f32.xlu1 %v2952_v61 }
  0xdd   : > { %495 = vadd.xlane.f32.xlu2 %v474_v62  ;;  %v2295_v62 = vld [vmem:[#allocation7 + $0x38] sm:$0xf0] }
  0xde   : > { %v2157_v0 = vor.u32 %v2295_v62, %v2156_v58  ;;  %1043 = vmatpush.bf16.msra.mxu2 %v2997_v25  ;;  %995 = vmatpush.bf16.msra.mxu1 %v3007_v44 }
  0xe0   : > { %944 = vmatpush.bf16.msra.mxu0 %v2157_v0  ;;  %2317 = vmatpush.bf16.msra.mxu3 %v2157_v0 }
  0xe2   : > { %1044 = vmatpush.bf16.msra.mxu2 %v3009_v46 }
  0xe4   : > { %945 = vmatpush.bf16.msra.mxu0 %v2145_v18  ;;  %2318 = vmatpush.bf16.msra.mxu3 %v2145_v18 }
  0xe8   : > { %946 = vmatpush.bf16.msra.mxu0 %v2133_v36  ;;  %2319 = vmatpush.bf16.msra.mxu3 %v2133_v36 }
  0xec   : > { %2320 = vmatpush.bf16.msrb.mxu3 %v2957_v6 }
  0xf0   : > { %2321 = vmatpush.bf16.msrb.mxu3 %v2963_v15 }
  0xf4   : > { %2322 = vmatpush.bf16.msrb.mxu3 %v2969_v27 }
  0xf8   : > { %2323 = vmatpush.bf16.msrb.mxu3 %v2975_v40 }
  0xfc   : > { %2324 = vmatpush.bf16.msrb.mxu3 %v2981_v55 }
 0x100   : > { %2325 = vmatpush.bf16.msrb.mxu3 %v2987_v4 }
 0x104   : > { %2326 = vmatpush.bf16.msrb.mxu3 %v2995_v24 }
 0x108   : > { %2327 = vmatpush.bf16.msrb.mxu3 %v3007_v44 }
 0x126   : > { %v510_v9 = vpop.xlane.xlu0 %509 }
 0x127   : > { %v486_v8 = vpop.xlane.xlu1 %485  ;;  %v529_v14 = vmul.f32 %v510_v9, %v2880_v16 }
 0x128   : > { %v517_v13 = vmul.f32 %v486_v8, %v2880_v16 }
 0x129   : > { %v3001_v29 = vadd.f32 1e-05, %v529_v14 }
 0x12a   : > { %v2999_v26 = vadd.f32 1e-05, %v517_v13 }
 0x12b   : > { %vm675_vm4 = vweird.f32 %v3001_v29 }
 0x12c   : > { %2448 = vrsqrt.f32 %v2999_v26  ;;  %vm555_vm2 = vweird.f32 %v2999_v26 }
 0x12d   : > { %2450 = vrsqrt.f32 %v3001_v29 }
 0x12e   : > { %v413_v50 = vpop.xlane.xlu0 %412 }
 0x12f   : > { %v512_v49 = vpop.xlane.xlu1 %511  ;;  %v488_v52 = vpop.xlane.xlu2 %487  ;;  %v444_v58 = vmul.f32 %v2880_v16, %v413_v50 }
 0x130   : > { %v530_v51 = vmul.f32 %v512_v49, %v2880_v16  ;;  %v518_v62 = vmul.f32 %v488_v52, %v2880_v16 }
 0x131   : > { %v3022_v1 = vsub.f32 %v2900_v33, %v444_v58 }
 0x132   : > { %v3017_v63 = vpop.eup %2448  ;;  %v3019_v0 = vadd.f32 1e-05, %v530_v51  ;;  %v3028_v8 = vadd.f32 1e-05, %v518_v62 }
 0x133   : > { %v3024_v2 = vpop.eup %2450  ;;  %v550_v3 = vmul.f32 %v3017_v63, %v2999_v26  ;;  %v476_v33 = vmul.f32 %v3022_v1, %v3022_v1  ;;  %vm556_vm1 = vweird.f32 %v3017_v63 }
 0x134   : > { %v670_v9 = vmul.f32 %v3024_v2, %v3001_v29  ;;  %2452 = vrsqrt.f32 %v3019_v0  ;;  %vm3058_vm3 = vmor %vm555_vm2, %vm556_vm1  ;;  %vm676_vm5 = vweird.f32 %v3024_v2  ;;  %vm685_vm6 = vweird.f32 %v3019_v0 }
 0x135   : > { %v551_v6 = vmul.f32 %v3017_v63, %v550_v3  ;;  %2454 = vrsqrt.f32 %v3028_v8  ;;  %499 = vadd.xlane.f32.xlu0 %v476_v33  ;;  %vm3074_vm7 = vmor %vm675_vm4, %vm676_vm5  ;;  %vm565_vm11 = vweird.f32 %v3028_v8 }
 0x136   : > { %v671_v10 = vmul.f32 %v3024_v2, %v670_v9 }
 0x137   : > { %v552_v11 = vmul.f32 0.5, %v551_v6  ;;  %v490_v12 = vpop.xlane.xlu1 %489  ;;  %v514_v13 = vpop.xlane.xlu0 %513 }
 0x138   : > { %v672_v14 = vmul.f32 0.5, %v671_v10  ;;  %v519_v18 = vmul.f32 %v490_v12, %v2880_v16  ;;  %v411_v19 = vpop.xlane.xlu2 %410  ;;  %v531_v20 = vmul.f32 %v514_v13, %v2880_v16 }
 0x139   : > { %v553_v15 = vsub.f32 1.5, %v552_v11  ;;  %v443_v23 = vmul.f32 %v2880_v16, %v411_v19  ;;  %v3087_v19 = vld [vmem:[#allocation4] ss:$0 sm:$0xff] }
 0x13a   : > { %v2453_v32 = vpop.eup %2452  ;;  %v673_v34 = vsub.f32 1.5, %v672_v14  ;;  %v3043_v35 = vadd.f32 1e-05, %v519_v18  ;;  %v3045_v36 = vadd.f32 1e-05, %v531_v20 }
 0x13b   : > { %v2455_v38 = vpop.eup %2454  ;;  %v554_v39 = vmul.f32 %v3017_v63, %v553_v15  ;;  %v680_v43 = vmul.f32 %v2453_v32, %v3019_v0  ;;  %v3051_v49 = vsub.f32 %v2917_v45, %v443_v23  ;;  %vm686_vm8 = vweird.f32 %v2453_v32 }
 0x13c   : > { %v560_v27 = vmul.f32 %v2455_v38, %v3028_v8  ;;  %2456 = vrsqrt.f32 %v3043_v35  ;;  %v674_v52 = vmul.f32 %v3024_v2, %v673_v34  ;;  %vm566_vm9 = vweird.f32 %v2455_v38  ;;  %vm687_vm10 = vmor %vm685_vm6, %vm686_vm8 }
 0x13d   : > { %v681_v50 = vmul.f32 %v2453_v32, %v680_v43  ;;  %2458 = vrsqrt.f32 %v3045_v36  ;;  %v558_v40 = vsel %vm3058_vm3, %v3017_v63, %v554_v39  ;;  %v475_v26 = vmul.f32 %v3051_v49, %v3051_v49  ;;  %vm567_vm12 = vmor %vm565_vm11, %vm566_vm9 }
 0x13e   : > { %v561_v45 = vmul.f32 %v2455_v38, %v560_v27  ;;  %v709_v13 = vmul.f32 %v558_v40, %v2886_v22  ;;  %v678_v14 = vsel %vm3074_vm7, %v3024_v2, %v674_v52  ;;  %v3113_v52 = vld [vmem:[#allocation6] ss:$0 sm:$0xff]  ;;  %vm695_vm13 = vweird.f32 %v3045_v36 }
 0x13f   : > { %v682_v58 = vmul.f32 0.5, %v681_v50  ;;  %v516_v62 = vpop.xlane.xlu1 %515  ;;  %v417_v3 = vpop.xlane.xlu0 %416  ;;  %497 = vadd.xlane.f32.xlu2 %v475_v26  ;;  %v721_v43 = vmul.f32 %v678_v14, %v2884_v21  ;;  %vm575_vm0 = vweird.f32 %v3043_v35 }
 0x140   : > { %v562_v9 = vmul.f32 0.5, %v561_v45  ;;  %v532_v6 = vmul.f32 %v516_v62, %v2880_v16  ;;  %v492_v33 = vpop.xlane.xlu2 %491  ;;  %v446_v29 = vmul.f32 %v2880_v16, %v417_v3  ;;  %v728_v51 = vmul.f32 %v3087_v19, %v709_v13 }
 0x141   : > { %v683_v63 = vsub.f32 1.5, %v682_v58  ;;  %v520_v11 = vmul.f32 %v492_v33, %v2880_v16 }
 0x142   : > { %v3079_v12 = vpop.eup %2456  ;;  %v563_v18 = vsub.f32 1.5, %v562_v9  ;;  %v3085_v55 = vadd.f32 1e-05, %v532_v6  ;;  %v3096_v39 = vsub.f32 %v2932_v53, %v446_v29  ;;  %v740_v6 = vmul.f32 %v3087_v19, %v721_v43 }
 0x143   : > { %v3089_v20 = vpop.eup %2458  ;;  %v684_v15 = vmul.f32 %v2453_v32, %v683_v63  ;;  %v570_v23 = vmul.f32 %v3079_v12, %v3043_v35  ;;  %v3093_v34 = vadd.f32 1e-05, %v520_v11  ;;  %vm576_vm14 = vweird.f32 %v3079_v12 }
 0x144   : > { %v564_v22 = vmul.f32 %v2455_v38, %v563_v18  ;;  %v690_v2 = vmul.f32 %v3089_v20, %v3045_v36  ;;  %2460 = vrsqrt.f32 %v3085_v55  ;;  %v478_v21 = vmul.f32 %v3096_v39, %v3096_v39  ;;  %vm3155_vm1 = vmor %vm575_vm0, %vm576_vm14 }
 0x145   : > { %v688_v27 = vsel %vm687_vm10, %v2453_v32, %v684_v15  ;;  %v571_v53 = vmul.f32 %v3079_v12, %v570_v23  ;;  %2462 = vrsqrt.f32 %v3093_v34  ;;  %v747_v63 = vadd.f32 %v3113_v52, %v728_v51 }
 0x146   : > { %v722_v0 = vmul.f32 %v688_v27, %v2894_v30  ;;  %v568_v50 = vsel %vm567_vm12, %v2455_v38, %v564_v22  ;;  %v691_v8 = vmul.f32 %v3089_v20, %v690_v2  ;;  %vm696_vm15 = vweird.f32 %v3089_v20 }
 0x147   : > { %v710_v4 = vmul.f32 %v568_v50, %v2896_v31  ;;  %v572_v45 = vmul.f32 0.5, %v571_v53  ;;  %v494_v32 = vpop.xlane.xlu1 %493  ;;  %v419_v40 = vpop.xlane.xlu0 %418  ;;  %503 = vadd.xlane.f32.xlu2 %v478_v21  ;;  %v759_v43 = vadd.f32 %v3113_v52, %v740_v6  ;;  %vm705_vm2 = vweird.f32 %v3085_v55  ;;  %vm3169_vm3 = vmor %vm695_vm13, %vm696_vm15 }
 0x148   : > { %v692_v58 = vmul.f32 0.5, %v691_v8  ;;  %v521_v30 = vmul.f32 %v494_v32, %v2880_v16  ;;  %v415_v38 = vpop.xlane.xlu2 %414  ;;  %v447_v26 = vmul.f32 %v2880_v16, %v419_v40  ;;  %v741_v62 = vmul.f32 %v3087_v19, %v722_v0 }
 0x149   : > { %v573_v3 = vsub.f32 1.5, %v572_v45  ;;  %v445_v31 = vmul.f32 %v2880_v16, %v415_v38  ;;  %v729_v9 = vmul.f32 %v3087_v19, %v710_v4  ;;  %vm585_vm7 = vweird.f32 %v3093_v34 }
 0x14a   : > { %v3126_v33 = vpop.eup %2460  ;;  %v693_v29 = vsub.f32 1.5, %v692_v58  ;;  %v3129_v10 = vadd.f32 1e-05, %v521_v30  ;;  %v760_v14 = vadd.f32 %v3113_v52, %v741_v62  ;;  %v3143_v23 = vsub.f32 %v2940_v57, %v447_v26 }
 0x14b   : > { %v2463_v11 = vpop.eup %2462  ;;  %v700_v24 = vmul.f32 %v3126_v33, %v3085_v55  ;;  %v3136_v13 = vsub.f32 %v2944_v59, %v445_v31  ;;  %v574_v18 = vmul.f32 %v3079_v12, %v573_v3  ;;  %v748_v59 = vadd.f32 %v3113_v52, %v729_v9 }
 0x14c   : > { %v580_v15 = vmul.f32 %v2463_v11, %v3093_v34  ;;  %2464 = vrsqrt.f32 %v3129_v10  ;;  %v694_v22 = vmul.f32 %v3089_v20, %v693_v29  ;;  %v3160_v50 = vpack.c.bf16 %v760_v14, %v759_v43 }
 0x14d   : > { %v701_v2 = vmul.f32 %v3126_v33, %v700_v24  ;;  %v477_v53 = vmul.f32 %v3136_v13, %v3136_v13  ;;  %v763_v0 = vpack.c.bf16 %v748_v59, %v747_v63  ;;  %v578_v35 = vsel %vm3155_vm1, %v3079_v12, %v574_v18 }
 0x14e   : > { %v581_v27 = vmul.f32 %v2463_v11, %v580_v15  ;;  %v479_v45 = vmul.f32 %v3143_v23, %v3143_v23  ;;  %v698_v12 = vsel %vm3169_vm3, %v3089_v20, %v694_v22  ;;  %vm706_vm4 = vweird.f32 %v3126_v33  ;;  %977 = vmatmul.bf16.vlgmr.msra.gmra.mxu3 %v3160_v50 }
 0x14f   : > { %v702_v44 = vmul.f32 0.5, %v701_v2  ;;  %v421_v8 = vpop.xlane.xlu1 %420  ;;  %501 = vadd.xlane.f32.xlu1 %v477_v53  ;;  %947 = vmatmul.bf16.vlgmr.msra.gmra.mxu0 %v763_v0  ;;  %vm586_vm5 = vweird.f32 %v2463_v11  ;;  %v711_v26 = vmul.f32 %v578_v35, %v2907_v37  ;;  %v723_v31 = vmul.f32 %v698_v12, %v2910_v41  ;;  %vm707_vm6 = vmor %vm705_vm2, %vm706_vm4 }
 0x150   : > { %v582_v4 = vmul.f32 0.5, %v581_v27  ;;  %v448_v21 = vmul.f32 %v2880_v16, %v421_v8  ;;  %v496_v32 = vpop.xlane.xlu2 %495  ;;  %996 = vmatmul.bf16.vlgmr.msra.gmra.mxu1 %v763_v0  ;;  %1045 = vmatmul.bf16.vlgmr.msra.gmra.mxu2 %v763_v0  ;;  %vm587_vm8 = vmor %vm585_vm7, %vm586_vm5  ;;  %vm595_vm9 = vweird.f32 %v3129_v10 }
 0x151   : > { %v703_v40 = vsub.f32 1.5, %v702_v44  ;;  %v522_v36 = vmul.f32 %v496_v32, %v2880_v16  ;;  %505 = vadd.xlane.f32.xlu0 %v479_v45  ;;  %2328 = vmatpush.bf16.msra.mxu3 %v2959_v7  ;;  %v730_v55 = vmul.f32 %v3087_v19, %v711_v26  ;;  %v742_v34 = vmul.f32 %v3087_v19, %v723_v31 }
 0x152   : > { %v2465_v58 = vpop.eup %2464  ;;  %v583_v30 = vsub.f32 1.5, %v582_v4  ;;  %v3183_v38 = vsub.f32 %v2952_v61, %v448_v21 }
 0x153   : > { %v704_v20 = vmul.f32 %v3126_v33, %v703_v40  ;;  %v590_v62 = vmul.f32 %v2465_v58, %v3129_v10  ;;  %v538_v3 = vadd.f32 1e-05, %v522_v36  ;;  %vm596_vm10 = vweird.f32 %v2465_v58 }
 0x154   : > { %v584_v9 = vmul.f32 %v2463_v11, %v583_v30  ;;  %v480_v37 = vmul.f32 %v3183_v38, %v3183_v38  ;;  %v761_v22 = vadd.f32 %v3113_v52, %v742_v34  ;;  %vm597_vm11 = vmor %vm595_vm9, %vm596_vm10 }
 0x155   : > { %v708_v61 = vsel %vm707_vm6, %v3126_v33, %v704_v20  ;;  %v591_v6 = vmul.f32 %v2465_v58, %v590_v62  ;;  %2466 = vrsqrt.f32 %v538_v3  ;;  %2329 = vmatpush.bf16.msra.mxu3 %v2965_v17  ;;  %vm605_vm12 = vweird.f32 %v538_v3 }
 0x156   : > { %v724_v7 = vmul.f32 %v708_v61, %v2921_v47  ;;  %v588_v41 = vsel %vm587_vm8, %v2463_v11, %v584_v9  ;;  %v749_v47 = vadd.f32 %v3113_v52, %v730_v55  ;;  %vm1118_vm6 = vcmask 519168  }
 0x157   : > { %v712_v29 = vmul.f32 %v588_v41, %v2924_v48  ;;  %v592_v63 = vmul.f32 0.5, %v591_v6  ;;  %507 = vadd.xlane.f32.xlu1 %v480_v37 }
 0x158   : > { %v743_v24 = vmul.f32 %v3087_v19, %v724_v7 }
 0x159   : > { %v593_v33 = vsub.f32 1.5, %v592_v63  ;;  %v731_v14 = vmul.f32 %v3087_v19, %v712_v29  ;;  %2330 = vmatpush.bf16.msra.mxu3 %v2971_v28 }
 0x15a   : > { %v762_v18 = vadd.f32 %v3113_v52, %v743_v24  ;;  %v803_v24 = vld [vmem:[%s3716_s4] sm:$0x7] }
 0x15b   : > { %v2467_v15 = vpop.eup %2466  ;;  %v750_v48 = vadd.f32 %v3113_v52, %v731_v14  ;;  %v594_v17 = vmul.f32 %v2465_v58, %v593_v33 }
 0x15c   : > { %v600_v11 = vmul.f32 %v2467_v15, %v538_v3  ;;  %v770_v43 = vpack.c.bf16 %v762_v18, %v761_v22  ;;  %vm606_vm13 = vweird.f32 %v2467_v15 }
 0x15d   : > { %v764_v2 = vpack.c.bf16 %v750_v48, %v749_v47  ;;  %2331 = vmatpush.bf16.msra.mxu3 %v2977_v42  ;;  %v598_v27 = vsel %vm597_vm11, %v2465_v58, %v594_v17  ;;  %vm607_vm14 = vmor %vm605_vm12, %vm606_vm13  ;;  %v3241_v48 = vperm.slane %v803_v24, 0 }
 0x15e   : > { %v601_v59 = vmul.f32 %v2467_v15, %v600_v11  ;;  %982 = vmatmul.bf16.gmra.mxu3 %v770_v43  ;;  %v713_v28 = vmul.f32 %v598_v27, %v2935_v54 }
 0x15f   : > { %952 = vmatmul.bf16.gmra.mxu0 %v764_v2 }
 0x160   : > { %v602_v53 = vmul.f32 0.5, %v601_v59  ;;  %1001 = vmatmul.bf16.gmra.mxu1 %v764_v2  ;;  %1050 = vmatmul.bf16.gmra.mxu2 %v764_v2  ;;  %v732_v42 = vmul.f32 %v3087_v19, %v713_v28 }
 0x161   : > { %2332 = vmatpush.bf16.msra.mxu3 %v2983_v56 }
 0x162   : > { %v603_v10 = vsub.f32 1.5, %v602_v53  ;;  %v751_v35 = vadd.f32 %v3113_v52, %v732_v42 }
 0x164   : > { %v604_v57 = vmul.f32 %v2467_v15, %v603_v10 }
 0x165   : > { %2333 = vmatpush.bf16.msra.mxu3 %v2989_v5 }
 0x166   : > { %v608_v44 = vsel %vm607_vm14, %v2467_v15, %v604_v57 }
 0x167   : > { %v714_v0 = vmul.f32 %v608_v44, %v2949_v60 }
 0x169   : > { %v733_v8 = vmul.f32 %v3087_v19, %v714_v0  ;;  %2334 = vmatpush.bf16.msra.mxu3 %v2997_v25 }
 0x16b   : > { %v752_v51 = vadd.f32 %v3113_v52, %v733_v8 }
 0x16d   : > { %v765_v54 = vpack.c.bf16 %v752_v51, %v751_v35  ;;  %2335 = vmatpush.bf16.msra.mxu3 %v3009_v46 }
 0x16e   : > { %1026 = vmatmul.bf16.vlgmr.msrb.gmra.mxu3 %v3160_v50 }
 0x16f   : > { %957 = vmatmul.bf16.gmra.mxu0 %v765_v54 }
 0x170   : > { %1006 = vmatmul.bf16.gmra.mxu1 %v765_v54  ;;  %1055 = vmatmul.bf16.gmra.mxu2 %v765_v54 }
 0x17e   : > { %1031 = vmatmul.bf16.gmra.mxu3 %v770_v43 }
 0x18e   : > { %1075 = vmatmul.bf16.vlgmr.msra.gmra.mxu3 %v3160_v50 }
 0x19e   : > { %1080 = vmatmul.bf16.gmra.mxu3 %v770_v43 }
 0x1a8   : > { %v500_v60 = vpop.xlane.xlu0 %499 }
 0x1a9   : > { %v524_v56 = vmul.f32 %v500_v60, %v2880_v16 }
 0x1ab   : > { %v540_v5 = vadd.f32 1e-05, %v524_v56  ;;  %v3265_v56 = vperm.slane %v803_v24, 2 }
 0x1ad   : > { %2468 = vrsqrt.f32 %v540_v5  ;;  %vm625_vm15 = vweird.f32 %v540_v5 }
 0x1b2   : > { %v498_v4 = vpop.xlane.xlu2 %497 }
 0x1b3   : > { %v2469_v45 = vpop.eup %2468  ;;  %v523_v25 = vmul.f32 %v498_v4, %v2880_v16 }
 0x1b4   : > { %v620_v21 = vmul.f32 %v2469_v45, %v540_v5  ;;  %vm626_vm0 = vweird.f32 %v2469_v45 }
 0x1b5   : > { %v539_v46 = vadd.f32 1e-05, %v523_v25  ;;  %vm627_vm1 = vmor %vm625_vm15, %vm626_vm0 }
 0x1b6   : > { %v621_v32 = vmul.f32 %v2469_v45, %v620_v21 }
 0x1b7   : > { %2470 = vrsqrt.f32 %v539_v46  ;;  %vm615_vm3 = vweird.f32 %v539_v46 }
 0x1b8   : > { %v622_v12 = vmul.f32 0.5, %v621_v32 }
 0x1ba   : > { %v504_v40 = vpop.xlane.xlu2 %503  ;;  %v623_v36 = vsub.f32 1.5, %v622_v12 }
 0x1bb   : > { %v526_v58 = vmul.f32 %v504_v40, %v2880_v16 }
 0x1bc   : > { %v624_v20 = vmul.f32 %v2469_v45, %v623_v36 }
 0x1bd   : > { %v2471_v50 = vpop.eup %2470  ;;  %v542_v30 = vadd.f32 1e-05, %v526_v58 }
 0x1be   : > { %v610_v26 = vmul.f32 %v2471_v50, %v539_v46  ;;  %v628_v37 = vsel %vm627_vm1, %v2469_v45, %v624_v20  ;;  %vm616_vm2 = vweird.f32 %v2471_v50 }
 0x1bf   : > { %2472 = vrsqrt.f32 %v542_v30  ;;  %v716_v63 = vmul.f32 %v628_v37, %v3022_v1  ;;  %vm617_vm4 = vmor %vm615_vm3, %vm616_vm2  ;;  %v3243_v1 = vperm.slane %v803_v24, 1  ;;  %vm645_vm5 = vweird.f32 %v542_v30 }
 0x1c0   : > { %v611_v62 = vmul.f32 %v2471_v50, %v610_v26 }
 0x1c1   : > { %v735_v22 = vmul.f32 %v3087_v19, %v716_v63 }
 0x1c2   : > { %v502_v3 = vpop.xlane.xlu1 %501  ;;  %v612_v31 = vmul.f32 0.5, %v611_v62 }
 0x1c3   : > { %v525_v9 = vmul.f32 %v502_v3, %v2880_v16  ;;  %v754_v0 = vadd.f32 %v3113_v52, %v735_v22 }
 0x1c4   : > { %v613_v61 = vsub.f32 1.5, %v612_v31  ;;  %v506_v7 = vpop.xlane.xlu0 %505 }
 0x1c5   : > { %v3229_v6 = vadd.f32 1e-05, %v525_v9  ;;  %v2473_v41 = vpop.eup %2472  ;;  %v527_v29 = vmul.f32 %v506_v7, %v2880_v16 }
 0x1c6   : > { %v614_v55 = vmul.f32 %v2471_v50, %v613_v61  ;;  %v640_v34 = vmul.f32 %v2473_v41, %v542_v30  ;;  %vm646_vm7 = vweird.f32 %v2473_v41 }
 0x1c7   : > { %2474 = vrsqrt.f32 %v3229_v6  ;;  %v3237_v33 = vadd.f32 1e-05, %v527_v29  ;;  %vm3259_vm8 = vmor %vm645_vm5, %vm646_vm7  ;;  %vm635_vm10 = vweird.f32 %v3229_v6 }
 0x1c8   : > { %v618_v14 = vsel %vm617_vm4, %v2471_v50, %v614_v55  ;;  %v641_v18 = vmul.f32 %v2473_v41, %v640_v34 }
 0x1c9   : > { %v715_v15 = vmul.f32 %v618_v14, %v3051_v49  ;;  %2476 = vrsqrt.f32 %v3237_v33  ;;  %vm655_vm12 = vweird.f32 %v3237_v33 }
 0x1ca   : > { %v508_v47 = vpop.xlane.xlu1 %507  ;;  %v642_v17 = vmul.f32 0.5, %v641_v18 }
 0x1cb   : > { %v528_v11 = vmul.f32 %v508_v47, %v2880_v16  ;;  %v734_v2 = vmul.f32 %v3087_v19, %v715_v15 }
 0x1cc   : > { %v643_v43 = vsub.f32 1.5, %v642_v17  ;;  %v948_v49 = vpop.f32.mrf.mxu0 }
 0x1cd   : > { %v2475_v59 = vpop.eup %2474  ;;  %v3248_v27 = vadd.f32 1e-05, %v528_v11  ;;  %v997_v53 = vpop.f32.mrf.mxu1  ;;  %v949_v28 = vadd.f32 %v948_v49, %v3241_v48  ;;  %v753_v44 = vadd.f32 %v3113_v52, %v734_v2 }
 0x1ce   : > { %v630_v10 = vmul.f32 %v2475_v59, %v3229_v6  ;;  %v998_v16 = vadd.f32 %v997_v53, %v3243_v1  ;;  %v644_v57 = vmul.f32 %v2473_v41, %v643_v43  ;;  %vm636_vm9 = vweird.f32 %v2475_v59 }
 0x1cf   : > { %2478 = vrsqrt.f32 %v3248_v27  ;;  %v3256_v42 = vpop.eup %2476  ;;  %v766_v60 = vpack.c.bf16 %v754_v0, %v753_v44  ;;  %vm637_vm11 = vmor %vm635_vm10, %vm636_vm9  ;;  %vm665_vm13 = vweird.f32 %v3248_v27 }
 0x1d0   : > { %v631_v8 = vmul.f32 %v2475_v59, %v630_v10  ;;  %v1086_v35 = vpack.c.bf16 %v998_v16, %v949_v28  ;;  %v650_v54 = vmul.f32 %v3256_v42, %v3237_v33  ;;  %v648_v5 = vsel %vm3259_vm8, %v2473_v41, %v644_v57 }
 0x1d1   : > { %962 = vmatmul.bf16.gmra.mxu0 %v766_v60  ;;  %1011 = vmatmul.bf16.gmra.mxu1 %v766_v60  ;;  %v3281_v46 = vpop.f32.mrf.mxu3  ;;  %v718_v40 = vmul.f32 %v648_v5, %v3096_v39  ;;  %vm656_vm14 = vweird.f32 %v3256_v42 }
 0x1d2   : > { %v632_v4 = vmul.f32 0.5, %v631_v8  ;;  %1119 = vst.msk [vmem:[%s3270_s10] sm:$0xf] %vm1118_vm6, %v1086_v35  ;;  %v1151_v45 = vrot.slane %v1086_v35, 4  ;;  %1215 = vrot.lane.b32.xlu2 %v1086_v35, %s2684_s12  ;;  %v651_v21 = vmul.f32 %v3256_v42, %v650_v54  ;;  %1060 = vmatmul.bf16.gmra.mxu2 %v766_v60  ;;  %vm3322_vm0 = vmor %vm655_vm12, %vm656_vm14 }
 0x1d3   : > { %v1046_v32 = vpop.f32.mrf.mxu2  ;;  %v737_v6 = vmul.f32 %v3087_v19, %v718_v40 }
 0x1d4   : > { %v633_v25 = vsub.f32 1.5, %v632_v4  ;;  %1183 = vst.msk [vmem:[%s3277_s13] sm:$0xf] %vm1118_vm6, %v1151_v45  ;;  %v1047_v36 = vadd.f32 %v1046_v32, %v3265_v56  ;;  %v950_v58 = vpop.f32.mrf.mxu0  ;;  %v652_v39 = vmul.f32 0.5, %v651_v21 }
 0x1d5   : > { %v3283_v12 = vpop.eup %2478  ;;  %v999_v50 = vpop.f32.mrf.mxu1  ;;  %v951_v20 = vadd.f32 %v950_v58, %v3241_v48  ;;  %v756_v47 = vadd.f32 %v3113_v52, %v737_v6 }
 0x1d6   : > { %v634_v30 = vmul.f32 %v2475_v59, %v633_v25  ;;  %v660_v26 = vmul.f32 %v3283_v12, %v3248_v27  ;;  %v1087_v62 = vpack.c.bf16 %v1047_v36, %v1047_v36  ;;  %v1000_v3 = vadd.f32 %v999_v50, %v3243_v1 }
 0x1d7   : > { %v653_v63 = vsub.f32 1.5, %v652_v39  ;;  %vm666_vm15 = vweird.f32 %v3283_v12 }
 0x1d8   : > { %v638_v31 = vsel %vm637_vm11, %v2475_v59, %v634_v30  ;;  %v661_v9 = vmul.f32 %v3283_v12, %v660_v26  ;;  %1199 = vst.msk [vmem:[%s3296_s16] sm:$0xf] %vm1118_vm6, %v1087_v62  ;;  %v1088_v61 = vpack.c.bf16 %v1000_v3, %v951_v20  ;;  %1345 = vrot.lane.b32.xlu0 %v1087_v62, %s2684_s12  ;;  %vm667_vm1 = vmor %vm665_vm13, %vm666_vm15 }
 0x1d9   : > { %v717_v37 = vmul.f32 %v638_v31, %v3136_v13  ;;  %v3307_v55 = vpop.f32.mrf.mxu3  ;;  %v654_v43 = vmul.f32 %v3256_v42, %v653_v63 }
 0x1da   : > { %v662_v7 = vmul.f32 0.5, %v661_v9  ;;  %1120 = vst.msk [vmem:[%s3270_s10 + $0x4] sm:$0xf] %vm1118_vm6, %v1088_v61  ;;  %v1152_v41 = vrot.slane %v1088_v61, 4 }
 0x1db   : > { %v736_v29 = vmul.f32 %v3087_v19, %v717_v37  ;;  %v1048_v34 = vpop.f32.mrf.mxu2  ;;  %v658_v33 = vsel %vm3322_vm0, %v3256_v42, %v654_v43 }
 0x1dc   : > { %v663_v13 = vsub.f32 1.5, %v662_v7  ;;  %1184 = vst.msk [vmem:[%s3277_s13 + $0x4] sm:$0xf] %vm1118_vm6, %v1152_v41  ;;  %v1049_v24 = vadd.f32 %v1048_v34, %v3265_v56  ;;  %v953_v14 = vpop.f32.mrf.mxu0  ;;  %v719_v42 = vmul.f32 %v658_v33, %v3143_v23  ;;  %v981_v34 = vadd.f32 %v3307_v55, %v3241_v48 }
 0x1dd   : > { %v1002_v18 = vpop.f32.mrf.mxu1  ;;  %v755_v15 = vadd.f32 %v3113_v52, %v736_v29  ;;  %v954_v11 = vadd.f32 %v953_v14, %v3241_v48 }
 0x1de   : > { %v664_v17 = vmul.f32 %v3283_v12, %v663_v13  ;;  %v1003_v22 = vadd.f32 %v1002_v18, %v3243_v1  ;;  %v1089_v2 = vpack.c.bf16 %v1049_v24, %v1049_v24  ;;  %v738_v4 = vmul.f32 %v3087_v19, %v719_v42 }
 0x1df   : > { %v767_v59 = vpack.c.bf16 %v756_v47, %v755_v15 }
 0x1e0   : > { %v1090_v53 = vpack.c.bf16 %v1003_v22, %v954_v11  ;;  %1200 = vst.msk [vmem:[%s3296_s16 + $0x4] sm:$0xf] %vm1118_vm6, %v1089_v2  ;;  %1347 = vrot.lane.b32.xlu2 %v1089_v2, %s2684_s12  ;;  %1217 = vrot.lane.b32.xlu0 %v1088_v61, %s2684_s12  ;;  %v668_v10 = vsel %vm667_vm1, %v3283_v12, %v664_v17 }
 0x1e1   : > { %967 = vmatmul.bf16.gmra.mxu0 %v767_v59  ;;  %1016 = vmatmul.bf16.gmra.mxu1 %v767_v59  ;;  %v3341_v27 = vpop.f32.mrf.mxu3  ;;  %v720_v57 = vmul.f32 %v668_v10, %v3183_v38 }
 0x1e2   : > { %1121 = vst.msk [vmem:[%s3270_s10 + $0x8] sm:$0xf] %vm1118_vm6, %v1090_v53  ;;  %v1153_v28 = vrot.slane %v1090_v53, 4  ;;  %1219 = vrot.lane.b32.xlu1 %v1090_v53, %s2684_s12  ;;  %1065 = vmatmul.bf16.gmra.mxu2 %v767_v59  ;;  %v984_v17 = vadd.f32 %v3341_v27, %v3241_v48 }
 0x1e3   : > { %v1051_v16 = vpop.f32.mrf.mxu2  ;;  %v739_v5 = vmul.f32 %v3087_v19, %v720_v57  ;;  %v757_v19 = vadd.f32 %v3113_v52, %v738_v4 }
 0x1e4   : > { %1185 = vst.msk [vmem:[%s3277_s13 + $0x8] sm:$0xf] %vm1118_vm6, %v1153_v28  ;;  %v1052_v44 = vadd.f32 %v1051_v16, %v3265_v56  ;;  %v955_v0 = vpop.f32.mrf.mxu0 }
 0x1e5   : > { %v1004_v8 = vpop.f32.mrf.mxu1  ;;  %v956_v35 = vadd.f32 %v955_v0, %v3241_v48  ;;  %v758_v12 = vadd.f32 %v3113_v52, %v739_v5  ;;  %v979_v52 = vadd.f32 %v3281_v46, %v3241_v48 }
 0x1e6   : > { %v1005_v51 = vadd.f32 %v1004_v8, %v3243_v1  ;;  %v1091_v54 = vpack.c.bf16 %v1052_v44, %v1052_v44 }
 0x1e7   : > { %v768_v30 = vpack.c.bf16 %v758_v12, %v757_v19 }
 0x1e8   : > { %v1092_v60 = vpack.c.bf16 %v1005_v51, %v956_v35  ;;  %1201 = vst.msk [vmem:[%s3296_s16 + $0x8] sm:$0xf] %vm1118_vm6, %v1091_v54 }
 0x1e9   : > { %v3358_v23 = vpop.f32.mrf.mxu3 }
 0x1ea   : > { %1122 = vst.msk [vmem:[%s3270_s10 + $0xc] sm:$0xf] %vm1118_vm6, %v1092_v60  ;;  %v1154_v38 = vrot.slane %v1092_v60, 4  ;;  %1349 = vrot.lane.b32.xlu1 %v1091_v54, %s2684_s12  ;;  %1221 = vrot.lane.b32.xlu2 %v1092_v60, %s2684_s12  ;;  %v986_v43 = vadd.f32 %v3358_v23, %v3241_v48 }
 0x1eb   : > { %v1053_v45 = vpop.f32.mrf.mxu2 }
 0x1ec   : > { %1186 = vst.msk [vmem:[%s3277_s13 + $0xc] sm:$0xf] %vm1118_vm6, %v1154_v38  ;;  %v1054_v25 = vadd.f32 %v1053_v45, %v3265_v56  ;;  %v958_v21 = vpop.f32.mrf.mxu0 }
 0x1ed   : > { %v1007_v32 = vpop.f32.mrf.mxu1  ;;  %v959_v40 = vadd.f32 %v958_v21, %v3241_v48 }
 0x1ee   : > { %v1008_v36 = vadd.f32 %v1007_v32, %v3243_v1  ;;  %v1093_v58 = vpack.c.bf16 %v1054_v25, %v1054_v25 }
 0x1f0   : > { %v1094_v50 = vpack.c.bf16 %v1008_v36, %v959_v40  ;;  %1202 = vst.msk [vmem:[%s3296_s16 + $0xc] sm:$0xf] %vm1118_vm6, %v1093_v58  ;;  %1351 = vrot.lane.b32.xlu0 %v1093_v58, %s2684_s12 }
 0x1f1   : > { %972 = vmatmul.bf16.gmra.mxu0 %v768_v30  ;;  %1021 = vmatmul.bf16.gmra.mxu1 %v768_v30  ;;  %v1027_v20 = vpop.f32.mrf.mxu3 }
 0x1f2   : > { %1123 = vst.msk [vmem:[%s3270_s10 + $0x10] sm:$0xf] %vm1118_vm6, %v1094_v50  ;;  %v1155_v26 = vrot.slane %v1094_v50, 4  ;;  %1070 = vmatmul.bf16.gmra.mxu2 %v768_v30  ;;  %v1028_v3 = vadd.f32 %v1027_v20, %v3243_v1 }
 0x1f3   : > { %v1056_v62 = vpop.f32.mrf.mxu2 }
 0x1f4   : > { %1187 = vst.msk [vmem:[%s3277_s13 + $0x10] sm:$0xf] %vm1118_vm6, %v1155_v26  ;;  %v1057_v31 = vadd.f32 %v1056_v62, %v3265_v56  ;;  %v960_v39 = vpop.f32.mrf.mxu0  ;;  %v1110_v6 = vpack.c.bf16 %v1028_v3, %v979_v52 }
 0x1f5   : > { %v1009_v9 = vpop.f32.mrf.mxu1  ;;  %v961_v37 = vadd.f32 %v960_v39, %v3241_v48 }
 0x1f6   : > { %v1010_v61 = vadd.f32 %v1009_v9, %v3243_v1  ;;  %v1095_v7 = vpack.c.bf16 %v1057_v31, %v1057_v31  ;;  %1131 = vst.msk [vmem:[%s3270_s10 + $0x30] sm:$0xf] %vm1118_vm6, %v1110_v6  ;;  %v1163_v29 = vrot.slane %v1110_v6, 4  ;;  %1239 = vrot.lane.b32.xlu1 %v1110_v6, %s2684_s12 }
 0x1f8   : > { %v1096_v41 = vpack.c.bf16 %v1010_v61, %v961_v37  ;;  %1353 = vrot.lane.b32.xlu2 %v1095_v7, %s2684_s12  ;;  %1203 = vst.msk [vmem:[%s3296_s16 + $0x10] sm:$0xf] %vm1118_vm6, %v1095_v7  ;;  %1223 = vrot.lane.b32.xlu0 %v1094_v50, %s2684_s12 }
 0x1f9   : > { %1195 = vst.msk [vmem:[%s3277_s13 + $0x30] sm:$0xf] %vm1118_vm6, %v1163_v29  ;;  %v1029_v63 = vpop.f32.mrf.mxu3 }
 0x1fa   : > { %v1156_v46 = vrot.slane %v1096_v41, 4  ;;  %1124 = vst.msk [vmem:[%s3270_s10 + $0x14] sm:$0xf] %vm1118_vm6, %v1096_v41  ;;  %v1030_v24 = vadd.f32 %v1029_v63, %v3243_v1 }
 0x1fb   : > { %v1058_v13 = vpop.f32.mrf.mxu2 }
 0x1fc   : > { %1188 = vst.msk [vmem:[%s3277_s13 + $0x14] sm:$0xf] %vm1118_vm6, %v1156_v46  ;;  %v1059_v14 = vadd.f32 %v1058_v13, %v3265_v56  ;;  %v1112_v18 = vpack.c.bf16 %v1030_v24, %v981_v34 }
 0x1fe   : > { %v1097_v15 = vpack.c.bf16 %v1059_v14, %v1059_v14  ;;  %1132 = vst.msk [vmem:[%s3270_s10 + $0x34] sm:$0xf] %vm1118_vm6, %v1112_v18  ;;  %v1164_v47 = vrot.slane %v1112_v18, 4 }
 0x200   : > { %1355 = vrot.lane.b32.xlu1 %v1097_v15, %s2684_s12  ;;  %1225 = vrot.lane.b32.xlu2 %v1096_v41, %s2684_s12  ;;  %1204 = vst.msk [vmem:[%s3296_s16 + $0x14] sm:$0xf] %vm1118_vm6, %v1097_v15 }
 0x201   : > { %1241 = vrot.lane.b32.xlu0 %v1112_v18, %s2684_s12  ;;  %1196 = vst.msk [vmem:[%s3277_s13 + $0x34] sm:$0xf] %vm1118_vm6, %v1164_v47  ;;  %v1032_v55 = vpop.f32.mrf.mxu3 }
 0x202   : > { %v1033_v11 = vadd.f32 %v1032_v55, %v3243_v1 }
 0x204   : > { %v1114_v22 = vpack.c.bf16 %v1033_v11, %v984_v17 }
 0x206   : > { %1133 = vst.msk [vmem:[%s3270_s10 + $0x38] sm:$0xf] %vm1118_vm6, %v1114_v22  ;;  %v1165_v2 = vrot.slane %v1114_v22, 4 }
 0x208   : > { %1243 = vrot.lane.b32.xlu2 %v1114_v22, %s2684_s12  ;;  %1197 = vst.msk [vmem:[%s3277_s13 + $0x38] sm:$0xf] %vm1118_vm6, %v1165_v2 }
 0x209   : > { %v1034_v59 = vpop.f32.mrf.mxu3 }
 0x20a   : > { %v1035_v49 = vadd.f32 %v1034_v59, %v3243_v1 }
 0x20c   : > { %v3415_v53 = vpack.c.bf16 %v1035_v49, %v986_v43 }
 0x20e   : > { %1134 = vst.msk [vmem:[%s3270_s10 + $0x3c] sm:$0xf] %vm1118_vm6, %v3415_v53  ;;  %v1166_v10 = vrot.slane %v3415_v53, 4 }
 0x210   : > { %1198 = vst.msk [vmem:[%s3277_s13 + $0x3c] sm:$0xf] %vm1118_vm6, %v1166_v10 }
 0x211   : > { %v1076_v28 = vpop.f32.mrf.mxu3 }
 0x212   : > { %v1077_v33 = vadd.f32 %v1076_v28, %v3265_v56 }
 0x214   : > { %v3424_v27 = vpack.c.bf16 %v1077_v33, %v1077_v33 }
 0x216   : > { %1211 = vst.msk [vmem:[%s3296_s16 + $0x30] sm:$0xf] %vm1118_vm6, %v3424_v27 }
 0x219   : > { %v1078_v16 = vpop.f32.mrf.mxu3 }
 0x21a   : > { %v1079_v57 = vadd.f32 %v1078_v16, %v3265_v56 }
 0x21c   : > { %v3430_v44 = vpack.c.bf16 %v1079_v57, %v1079_v57 }
 0x21e   : > { %1212 = vst.msk [vmem:[%s3296_s16 + $0x34] sm:$0xf] %vm1118_vm6, %v3430_v44 }
 0x221   : > { %v1081_v0 = vpop.f32.mrf.mxu3 }
 0x222   : > { %v1082_v8 = vadd.f32 %v1081_v0, %v3265_v56 }
 0x224   : > { %v3436_v35 = vpack.c.bf16 %v1082_v8, %v1082_v8 }
 0x226   : > { %1213 = vst.msk [vmem:[%s3296_s16 + $0x38] sm:$0xf] %vm1118_vm6, %v3436_v35 }
 0x229   : > { %v1083_v51 = vpop.f32.mrf.mxu3 }
 0x22a   : > { %v1084_v54 = vadd.f32 %v1083_v51, %v3265_v56 }
 0x22c   : > { %v1216_v42 = vpop.permute.xlu2 %1215  ;;  %v3444_v5 = vpack.c.bf16 %v1084_v54, %v1084_v54 }
 0x22d   : > { %2226 = vst.msk [vmem:[%s3270_s10 + $0x40] sm:$0xf] %vm1118_vm6, %v1216_v42  ;;  %v1280_v60 = vrot.slane %v1216_v42, 4 }
 0x22e   : > { %1214 = vst.msk [vmem:[%s3296_s16 + $0x3c] sm:$0xf] %vm1118_vm6, %v3444_v5 }
 0x22f   : > { %2242 = vst.msk [vmem:[%s3277_s13 + $0x40] sm:$0xf] %vm1118_vm6, %v1280_v60 }
 0x23a   : > { %v1348_v38 = vpop.permute.xlu2 %1347 }
 0x23b   : > { %2259 = vst.msk [vmem:[%s3296_s16 + $0x44] sm:$0xf] %vm1118_vm6, %v1348_v38 }
 0x244   : > { %v1222_v4 = vpop.permute.xlu2 %1221 }
 0x245   : > { %2229 = vst.msk [vmem:[%s3270_s10 + $0x4c] sm:$0xf] %vm1118_vm6, %v1222_v4  ;;  %v1283_v23 = vrot.slane %v1222_v4, 4 }
 0x247   : > { %2245 = vst.msk [vmem:[%s3277_s13 + $0x4c] sm:$0xf] %vm1118_vm6, %v1283_v23 }
 0x24a   : > { %v1346_v45 = vpop.permute.xlu0 %1345 }
 0x24b   : > { %2258 = vst.msk [vmem:[%s3296_s16 + $0x40] sm:$0xf] %vm1118_vm6, %v1346_v45 }
 0x24e   : > { %v963_v25 = vpop.f32.mrf.mxu0  ;;  %v1012_v21 = vpop.f32.mrf.mxu1 }
 0x24f   : > { %v964_v32 = vadd.f32 %v963_v25, %v3241_v48  ;;  %v1013_v12 = vadd.f32 %v1012_v21, %v3243_v1 }
 0x251   : > { %v1098_v40 = vpack.c.bf16 %v1013_v12, %v964_v32 }
 0x252   : > { %v1354_v36 = vpop.permute.xlu2 %1353  ;;  %v1218_v58 = vpop.permute.xlu0 %1217 }
 0x253   : > { %2262 = vst.msk [vmem:[%s3296_s16 + $0x50] sm:$0xf] %vm1118_vm6, %v1354_v36  ;;  %v1281_v19 = vrot.slane %v1218_v58, 4  ;;  %v1157_v30 = vrot.slane %v1098_v40, 4  ;;  %1227 = vrot.lane.b32.xlu1 %v1098_v40, %s2684_s12 }
 0x254   : > { %v1220_v50 = vpop.permute.xlu1 %1219  ;;  %1125 = vst.msk [vmem:[%s3270_s10 + $0x18] sm:$0xf] %vm1118_vm6, %v1098_v40 }
 0x255   : > { %2227 = vst.msk [vmem:[%s3270_s10 + $0x44] sm:$0xf] %vm1118_vm6, %v1218_v58  ;;  %v1282_v26 = vrot.slane %v1220_v50, 4  ;;  %v1061_v20 = vpop.f32.mrf.mxu2 }
 0x256   : > { %1189 = vst.msk [vmem:[%s3277_s13 + $0x18] sm:$0xf] %vm1118_vm6, %v1157_v30  ;;  %v1062_v62 = vadd.f32 %v1061_v20, %v3265_v56  ;;  %v965_v52 = vpop.f32.mrf.mxu0  ;;  %v1014_v3 = vpop.f32.mrf.mxu1 }
 0x257   : > { %2243 = vst.msk [vmem:[%s3277_s13 + $0x44] sm:$0xf] %vm1118_vm6, %v1281_v19  ;;  %v966_v31 = vadd.f32 %v965_v52, %v3241_v48  ;;  %v1015_v39 = vadd.f32 %v1014_v3, %v3243_v1 }
 0x258   : > { %2228 = vst.msk [vmem:[%s3270_s10 + $0x48] sm:$0xf] %vm1118_vm6, %v1220_v50  ;;  %v1099_v9 = vpack.c.bf16 %v1062_v62, %v1062_v62 }
 0x259   : > { %2244 = vst.msk [vmem:[%s3277_s13 + $0x48] sm:$0xf] %vm1118_vm6, %v1282_v26  ;;  %v1100_v37 = vpack.c.bf16 %v1015_v39, %v966_v31 }
 0x25a   : > { %v1226_v61 = vpop.permute.xlu2 %1225  ;;  %1205 = vst.msk [vmem:[%s3296_s16 + $0x18] sm:$0xf] %vm1118_vm6, %v1099_v9  ;;  %1357 = vrot.lane.b32.xlu0 %v1099_v9, %s2684_s12 }
 0x25b   : > { %v1285_v6 = vrot.slane %v1226_v61, 4  ;;  %1126 = vst.msk [vmem:[%s3270_s10 + $0x1c] sm:$0xf] %vm1118_vm6, %v1100_v37  ;;  %v1158_v7 = vrot.slane %v1100_v37, 4  ;;  %1245 = vrot.lane.b32.xlu1 %v3415_v53, %s2684_s12 }
 0x25c   : > { %2231 = vst.msk [vmem:[%s3270_s10 + $0x54] sm:$0xf] %vm1118_vm6, %v1226_v61  ;;  %v1350_v41 = vpop.permute.xlu1 %1349 }
 0x25d   : > { %1190 = vst.msk [vmem:[%s3277_s13 + $0x1c] sm:$0xf] %vm1118_vm6, %v1158_v7  ;;  %v1063_v29 = vpop.f32.mrf.mxu2 }
 0x25e   : > { %2247 = vst.msk [vmem:[%s3277_s13 + $0x54] sm:$0xf] %vm1118_vm6, %v1285_v6  ;;  %v1064_v46 = vadd.f32 %v1063_v29, %v3265_v56  ;;  %v968_v63 = vpop.f32.mrf.mxu0  ;;  %v1017_v13 = vpop.f32.mrf.mxu1 }
 0x25f   : > { %2260 = vst.msk [vmem:[%s3296_s16 + $0x48] sm:$0xf] %vm1118_vm6, %v1350_v41  ;;  %v969_v34 = vadd.f32 %v968_v63, %v3241_v48  ;;  %v1018_v24 = vadd.f32 %v1017_v13, %v3243_v1 }
 0x260   : > { %v1101_v14 = vpack.c.bf16 %v1064_v46, %v1064_v46 }
 0x261   : > { %v1102_v18 = vpack.c.bf16 %v1018_v24, %v969_v34 }
 0x262   : > { %v1244_v15 = vpop.permute.xlu2 %1243  ;;  %v1352_v47 = vpop.permute.xlu0 %1351  ;;  %1206 = vst.msk [vmem:[%s3296_s16 + $0x1c] sm:$0xf] %vm1118_vm6, %v1101_v14  ;;  %1359 = vrot.lane.b32.xlu2 %v1101_v14, %s2684_s12  ;;  %1229 = vrot.lane.b32.xlu0 %v1100_v37, %s2684_s12 }
 0x263   : > { %v1294_v55 = vrot.slane %v1244_v15, 4  ;;  %1127 = vst.msk [vmem:[%s3270_s10 + $0x20] sm:$0xf] %vm1118_vm6, %v1102_v18  ;;  %v1159_v17 = vrot.slane %v1102_v18, 4 }
 0x264   : > { %2240 = vst.msk [vmem:[%s3270_s10 + $0x78] sm:$0xf] %vm1118_vm6, %v1244_v15 }
 0x265   : > { %1191 = vst.msk [vmem:[%s3277_s13 + $0x20] sm:$0xf] %vm1118_vm6, %v1159_v17  ;;  %v1066_v11 = vpop.f32.mrf.mxu2  ;;  %v1454_v17 = vld [vmem:[%s3270_s10 + $0x10] sm:$0xff] (%p2825_p0)  }
 0x266   : > { %2256 = vst.msk [vmem:[%s3277_s13 + $0x78] sm:$0xf] %vm1118_vm6, %v1294_v55  ;;  %v1067_v22 = vadd.f32 %v1066_v11, %v3265_v56  ;;  %v970_v2 = vpop.f32.mrf.mxu0  ;;  %v1019_v59 = vpop.f32.mrf.mxu1  ;;  %v1450_v55 = vld [vmem:[%s3270_s10 + $0x8] sm:$0xff] (%p2825_p0)   ;;  %v1458_v11 = vld [vmem:[%s3270_s10 + $0x18] sm:$0xff] (%p2825_p0)  }
 0x267   : > { %2261 = vst.msk [vmem:[%s3296_s16 + $0x4c] sm:$0xf] %vm1118_vm6, %v1352_v47  ;;  %v971_v43 = vadd.f32 %v970_v2, %v3241_v48  ;;  %v1020_v49 = vadd.f32 %v1019_v59, %v3243_v1  ;;  %v1446_v47 = vld [vmem:[%s3270_s10] sm:$0xff] (%p2825_p0)   ;;  %v1470_v59 = vld [vmem:[%s3270_s10 + $0x30] sm:$0xff] (%p2825_p0)  }
 0x268   : > { %v1103_v53 = vpack.c.bf16 %v1067_v22, %v1067_v22  ;;  %v1240_v28 = vpop.permute.xlu1 %1239  ;;  %1447 = vst [vmem:[%s1429_s17] sm:$0xff] (%p2825_p0), %v1446_v47  }
 0x269   : > { %v1104_v10 = vpack.c.bf16 %v1020_v49, %v971_v43  ;;  %v1292_v33 = vrot.slane %v1240_v28, 4  ;;  %2238 = vst.msk [vmem:[%s3270_s10 + $0x70] sm:$0xf] %vm1118_vm6, %v1240_v28  ;;  %v1474_v43 = vld [vmem:[%s3270_s10 + $0x38] sm:$0xff] (%p2825_p0)   ;;  %v1478_v49 = vld [vmem:[%s3270_s10 + $0x40] sm:$0xff] (%p2825_p0)  }
 0x26a   : > { %1207 = vst.msk [vmem:[%s3296_s16 + $0x20] sm:$0xf] %vm1118_vm6, %v1103_v53  ;;  %1231 = vrot.lane.b32.xlu2 %v1102_v18, %s2684_s12  ;;  %1369 = vrot.lane.b32.xlu0 %v3424_v27, %s2684_s12  ;;  %v1224_v16 = vpop.permute.xlu0 %1223 }
 0x26b   : > { %1128 = vst.msk [vmem:[%s3270_s10 + $0x24] sm:$0xf] %vm1118_vm6, %v1104_v10  ;;  %v1160_v57 = vrot.slane %v1104_v10, 4  ;;  %1361 = vrot.lane.b32.xlu1 %v1103_v53, %s2684_s12  ;;  %v1284_v0 = vrot.slane %v1224_v16, 4  ;;  %v1482_v53 = vld [vmem:[%s3270_s10 + $0x48] sm:$0xff] (%p2825_p0)  }
 0x26c   : > { %2254 = vst.msk [vmem:[%s3277_s13 + $0x70] sm:$0xf] %vm1118_vm6, %v1292_v33 }
 0x26d   : > { %1192 = vst.msk [vmem:[%s3277_s13 + $0x24] sm:$0xf] %vm1118_vm6, %v1160_v57  ;;  %v1068_v8 = vpop.f32.mrf.mxu2 }
 0x26e   : > { %v1069_v51 = vadd.f32 %v1068_v8, %v3265_v56  ;;  %v973_v27 = vpop.f32.mrf.mxu0  ;;  %v1022_v42 = vpop.f32.mrf.mxu1  ;;  %2230 = vst.msk [vmem:[%s3270_s10 + $0x50] sm:$0xf] %vm1118_vm6, %v1224_v16 }
 0x26f   : > { %v974_v54 = vadd.f32 %v973_v27, %v3241_v48  ;;  %v1023_v60 = vadd.f32 %v1022_v42, %v3243_v1  ;;  %2246 = vst.msk [vmem:[%s3277_s13 + $0x50] sm:$0xf] %vm1118_vm6, %v1284_v0 }
 0x270   : > { %v1105_v38 = vpack.c.bf16 %v1069_v51, %v1069_v51  ;;  %1451 = vst [vmem:[%s1429_s17 + $0x8] sm:$0xff] (%p2825_p0), %v1450_v55  }
 0x271   : > { %v1106_v4 = vpack.c.bf16 %v1023_v60, %v974_v54  ;;  %1455 = vst [vmem:[%s1429_s17 + $0x10] sm:$0xff] (%p2825_p0), %v1454_v17  }
 0x272   : > { %v1356_v23 = vpop.permute.xlu1 %1355  ;;  %1208 = vst.msk [vmem:[%s3296_s16 + $0x24] sm:$0xf] %vm1118_vm6, %v1105_v38  ;;  %1363 = vrot.lane.b32.xlu0 %v1105_v38, %s2684_s12  ;;  %v1462_v22 = vld [vmem:[%s3270_s10 + $0x20] sm:$0xff] (%p2825_p0)  }
 0x273   : > { %v1242_v45 = vpop.permute.xlu0 %1241  ;;  %1129 = vst.msk [vmem:[%s3270_s10 + $0x28] sm:$0xf] %vm1118_vm6, %v1106_v4  ;;  %v1161_v25 = vrot.slane %v1106_v4, 4  ;;  %1233 = vrot.lane.b32.xlu1 %v1104_v10, %s2684_s12 }
 0x274   : > { %v1293_v21 = vrot.slane %v1242_v45, 4  ;;  %2263 = vst.msk [vmem:[%s3296_s16 + $0x54] sm:$0xf] %vm1118_vm6, %v1356_v23 }
 0x275   : > { %1193 = vst.msk [vmem:[%s3277_s13 + $0x28] sm:$0xf] %vm1118_vm6, %v1161_v25  ;;  %v1071_v32 = vpop.f32.mrf.mxu2  ;;  %v1486_v10 = vld [vmem:[%s3270_s10 + $0x50] sm:$0xff] (%p2825_p0)  }
 0x276   : > { %2239 = vst.msk [vmem:[%s3270_s10 + $0x74] sm:$0xf] %vm1118_vm6, %v1242_v45  ;;  %v1072_v12 = vadd.f32 %v1071_v32, %v3265_v56  ;;  %v975_v40 = vpop.f32.mrf.mxu0  ;;  %v1024_v36 = vpop.f32.mrf.mxu1 }
 0x277   : > { %2255 = vst.msk [vmem:[%s3277_s13 + $0x74] sm:$0xf] %vm1118_vm6, %v1293_v21  ;;  %v976_v58 = vadd.f32 %v975_v40, %v3241_v48  ;;  %v1025_v19 = vadd.f32 %v1024_v36, %v3243_v1 }
 0x278   : > { %v1107_v50 = vpack.c.bf16 %v1072_v12, %v1072_v12  ;;  %1459 = vst [vmem:[%s1429_s17 + $0x18] sm:$0xff] (%p2825_p0), %v1458_v11  }
 0x279   : > { %v1108_v30 = vpack.c.bf16 %v1025_v19, %v976_v58  ;;  %1463 = vst [vmem:[%s1429_s17 + $0x20] sm:$0xff] (%p2825_p0), %v1462_v22  }
 0x27a   : > { %1209 = vst.msk [vmem:[%s3296_s16 + $0x28] sm:$0xf] %vm1118_vm6, %v1107_v50  ;;  %1365 = vrot.lane.b32.xlu2 %v1107_v50, %s2684_s12  ;;  %1235 = vrot.lane.b32.xlu0 %v1106_v4, %s2684_s12 }
 0x27b   : > { %1130 = vst.msk [vmem:[%s3270_s10 + $0x2c] sm:$0xf] %vm1118_vm6, %v1108_v30  ;;  %v1162_v26 = vrot.slane %v1108_v30, 4 }
 0x27c   : > { %1471 = vst [vmem:[%s1429_s17 + $0x30] sm:$0xff] (%p2825_p0), %v1470_v59  }
 0x27d   : > { %1194 = vst.msk [vmem:[%s3277_s13 + $0x2c] sm:$0xf] %vm1118_vm6, %v1162_v26  ;;  %v1073_v20 = vpop.f32.mrf.mxu2  ;;  %v1502_v57 = vld [vmem:[%s3270_s10 + $0x70] sm:$0xff] (%p2825_p0)  }
 0x27e   : > { %v1074_v48 = vadd.f32 %v1073_v20, %v3265_v56  ;;  %1475 = vst [vmem:[%s1429_s17 + $0x38] sm:$0xff] (%p2825_p0), %v1474_v43  }
 0x27f   : > { %1479 = vst [vmem:[%s1429_s17 + $0x80] sm:$0xff] (%p2825_p0), %v1478_v49  }
 0x280   : > { %v1109_v1 = vpack.c.bf16 %v1074_v48, %v1074_v48  ;;  %1483 = vst [vmem:[%s1429_s17 + $0x88] sm:$0xff] (%p2825_p0), %v1482_v53  }
 0x281   : > { %1487 = vst [vmem:[%s1429_s17 + $0x90] sm:$0xff] (%p2825_p0), %v1486_v10  }
 0x282   : > { %1210 = vst.msk [vmem:[%s3296_s16 + $0x2c] sm:$0xf] %vm1118_vm6, %v1109_v1  ;;  %1367 = vrot.lane.b32.xlu1 %v1109_v1, %s2684_s12  ;;  %1237 = vrot.lane.b32.xlu2 %v1108_v30, %s2684_s12  ;;  %v1466_v2 = vld [vmem:[%s3270_s10 + $0x28] sm:$0xff] (%p2825_p0)  }
 0x283   : > { %1375 = vrot.lane.b32.xlu0 %v3444_v5, %s2684_s12  ;;  %1467 = vst [vmem:[%s1429_s17 + $0x28] sm:$0xff] (%p2825_p0), %v1466_v2  }
 0x284   : > { %1503 = vst [vmem:[%s1429_s17 + $0xb0] sm:$0xff] (%p2825_p0), %v1502_v57  }
 0x28a   : > { %1373 = vrot.lane.b32.xlu1 %v3436_v35, %s2684_s12  ;;  %1371 = vrot.lane.b32.xlu2 %v3430_v44, %s2684_s12 }
 0x2bc   : > { %v1360_v56 = vpop.permute.xlu2 %1359 }
 0x2bd   : > { %2265 = vst.msk [vmem:[%s3296_s16 + $0x5c] sm:$0xf] %vm1118_vm6, %v1360_v56 }
 0x2c4   : > { %v1232_v62 = vpop.permute.xlu2 %1231 }
 0x2c5   : > { %2234 = vst.msk [vmem:[%s3270_s10 + $0x60] sm:$0xf] %vm1118_vm6, %v1232_v62  ;;  %v1288_v52 = vrot.slane %v1232_v62, 4  ;;  %v1228_v3 = vpop.permute.xlu1 %1227 }
 0x2c6   : > { %2232 = vst.msk [vmem:[%s3270_s10 + $0x58] sm:$0xf] %vm1118_vm6, %v1228_v3  ;;  %v1286_v5 = vrot.slane %v1228_v3, 4 }
 0x2c7   : > { %2250 = vst.msk [vmem:[%s3277_s13 + $0x60] sm:$0xf] %vm1118_vm6, %v1288_v52 }
 0x2c8   : > { %2248 = vst.msk [vmem:[%s3277_s13 + $0x58] sm:$0xf] %vm1118_vm6, %v1286_v5 }
 0x2cc   : > { %v1358_v44 = vpop.permute.xlu0 %1357 }
 0x2cd   : > { %2264 = vst.msk [vmem:[%s3296_s16 + $0x58] sm:$0xf] %vm1118_vm6, %v1358_v44  ;;  %v1246_v35 = vpop.permute.xlu1 %1245 }
 0x2ce   : > { %2241 = vst.msk [vmem:[%s3270_s10 + $0x7c] sm:$0xf] %vm1118_vm6, %v1246_v35  ;;  %v1295_v31 = vrot.slane %v1246_v35, 4 }
 0x2d0   : > { %2257 = vst.msk [vmem:[%s3277_s13 + $0x7c] sm:$0xf] %vm1118_vm6, %v1295_v31 }
 0x2d4   : > { %v1366_v39 = vpop.permute.xlu2 %1365  ;;  %v1230_v9 = vpop.permute.xlu0 %1229 }
 0x2d5   : > { %2268 = vst.msk [vmem:[%s3296_s16 + $0x68] sm:$0xf] %vm1118_vm6, %v1366_v39  ;;  %v1287_v37 = vrot.slane %v1230_v9, 4  ;;  %v1506_v0 = vld [vmem:[%s3270_s10 + $0x78] sm:$0xff] (%p2825_p0)  }
 0x2d6   : > { %2233 = vst.msk [vmem:[%s3270_s10 + $0x5c] sm:$0xf] %vm1118_vm6, %v1230_v9 }
 0x2d7   : > { %2249 = vst.msk [vmem:[%s3277_s13 + $0x5c] sm:$0xf] %vm1118_vm6, %v1287_v37 }
 0x2d8   : > { %1507 = vst [vmem:[%s1429_s17 + $0xb8] sm:$0xff] (%p2825_p0), %v1506_v0  }
 0x2dc   : > { %v1238_v61 = vpop.permute.xlu2 %1237  ;;  %v1370_v6 = vpop.permute.xlu0 %1369 }
 0x2dd   : > { %v1362_v7 = vpop.permute.xlu1 %1361  ;;  %2237 = vst.msk [vmem:[%s3270_s10 + $0x6c] sm:$0xf] %vm1118_vm6, %v1238_v61  ;;  %v1291_v41 = vrot.slane %v1238_v61, 4  ;;  %v1490_v28 = vld [vmem:[%s3270_s10 + $0x58] sm:$0xff] (%p2825_p0)  }
 0x2de   : > { %2266 = vst.msk [vmem:[%s3296_s16 + $0x60] sm:$0xf] %vm1118_vm6, %v1362_v7 }
 0x2df   : > { %2253 = vst.msk [vmem:[%s3277_s13 + $0x6c] sm:$0xf] %vm1118_vm6, %v1291_v41 }
 0x2e0   : > { %2270 = vst.msk [vmem:[%s3296_s16 + $0x70] sm:$0xf] %vm1118_vm6, %v1370_v6 }
 0x2e1   : > { %1491 = vst [vmem:[%s1429_s17 + $0x98] sm:$0xff] (%p2825_p0), %v1490_v28  }
 0x2e4   : > { %v1372_v29 = vpop.permute.xlu2 %1371  ;;  %v1364_v46 = vpop.permute.xlu0 %1363 }
 0x2e5   : > { %v1234_v63 = vpop.permute.xlu1 %1233  ;;  %2271 = vst.msk [vmem:[%s3296_s16 + $0x74] sm:$0xf] %vm1118_vm6, %v1372_v29 }
 0x2e6   : > { %2235 = vst.msk [vmem:[%s3270_s10 + $0x64] sm:$0xf] %vm1118_vm6, %v1234_v63  ;;  %v1289_v13 = vrot.slane %v1234_v63, 4 }
 0x2e7   : > { %2267 = vst.msk [vmem:[%s3296_s16 + $0x64] sm:$0xf] %vm1118_vm6, %v1364_v46 }
 0x2e8   : > { %2251 = vst.msk [vmem:[%s3277_s13 + $0x64] sm:$0xf] %vm1118_vm6, %v1289_v13 }
 0x2ec   : > { %v1236_v34 = vpop.permute.xlu0 %1235 }
 0x2ed   : > { %2236 = vst.msk [vmem:[%s3270_s10 + $0x68] sm:$0xf] %vm1118_vm6, %v1236_v34  ;;  %v1290_v24 = vrot.slane %v1236_v34, 4  ;;  %v1494_v33 = vld [vmem:[%s3270_s10 + $0x60] sm:$0xff] (%p2825_p0)  }
 0x2ee   : > { %1495 = vst [vmem:[%s1429_s17 + $0xa0] sm:$0xff] (%p2825_p0), %v1494_v33  }
 0x2ef   : > { %2252 = vst.msk [vmem:[%s3277_s13 + $0x68] sm:$0xf] %vm1118_vm6, %v1290_v24 }
 0x2f4   : > { %v1368_v14 = vpop.permute.xlu1 %1367  ;;  %v1498_v16 = vld [vmem:[%s3270_s10 + $0x68] sm:$0xff] (%p2825_p0)  }
 0x2f5   : > { %2269 = vst.msk [vmem:[%s3296_s16 + $0x6c] sm:$0xf] %vm1118_vm6, %v1368_v14  ;;  %v1376_v18 = vpop.permute.xlu0 %1375 }
 0x2f6   : > { %2273 = vst.msk [vmem:[%s3296_s16 + $0x7c] sm:$0xf] %vm1118_vm6, %v1376_v18 }
 0x2f7   : > { %1499 = vst [vmem:[%s1429_s17 + $0xa8] sm:$0xff] (%p2825_p0), %v1498_v16  }
 0x2f9   : > { %1424 = sbr.rel (!%p2825_p0) target bundleno = 766 (0x2fe), region = 60 }
 0x2fc   : > { %v1374_v15 = vpop.permute.xlu1 %1373 }
 0x2fd   : > { %2272 = vst.msk [vmem:[%s3296_s16 + $0x78] sm:$0xf] %vm1118_vm6, %v1374_v15 }
 0x2fe PF: > { %1597 = sbr.rel (!%p2825_p0) target bundleno = 792 (0x318), region = 101  ;;  %s3753_s20 = sld [smem:[#allocation15_spill]] (%p2825_p0)  ;;  %v1619_v8 = vld [vmem:[%s3277_s13] sm:$0xff] (%p2825_p0)   ;;  %v1623_v51 = vld [vmem:[%s3277_s13 + $0x8] sm:$0xff] (%p2825_p0)   ;;  %v1627_v27 = vld [vmem:[%s3277_s13 + $0x10] sm:$0xff] (%p2825_p0)  }
 0x2ff   : > { %s2280_s1 = sshll.u32 (%p2825_p0), %s2658_s27, 4  ;;  %s3754_s10 = sld [smem:[#allocation21_spill]] (%p2825_p0)  ;;  %v1631_v42 = vld [vmem:[%s3277_s13 + $0x18] sm:$0xff] (%p2825_p0)   ;;  %v1635_v54 = vld [vmem:[%s3277_s13 + $0x20] sm:$0xff] (%p2825_p0)   ;;  %v1639_v60 = vld [vmem:[%s3277_s13 + $0x28] sm:$0xff] (%p2825_p0)  }
 0x300   : > { %v1643_v38 = vld [vmem:[%s3277_s13 + $0x30] sm:$0xff] (%p2825_p0)   ;;  %v1647_v4 = vld [vmem:[%s3277_s13 + $0x38] sm:$0xff] (%p2825_p0)   ;;  %v1651_v23 = vld [vmem:[%s3277_s13 + $0x40] sm:$0xff] (%p2825_p0)  }
 0x301   : > { %v1655_v45 = vld [vmem:[%s3277_s13 + $0x48] sm:$0xff] (%p2825_p0)   ;;  %v1659_v25 = vld [vmem:[%s3277_s13 + $0x50] sm:$0xff] (%p2825_p0)   ;;  %v1663_v21 = vld [vmem:[%s3277_s13 + $0x58] sm:$0xff] (%p2825_p0)  }
 0x302   : > { %v1667_v32 = vld [vmem:[%s3277_s13 + $0x60] sm:$0xff] (%p2825_p0)   ;;  %v1671_v12 = vld [vmem:[%s3277_s13 + $0x68] sm:$0xff] (%p2825_p0)   ;;  %v1675_v40 = vld [vmem:[%s3277_s13 + $0x70] sm:$0xff] (%p2825_p0)  }
 0x303   : > { %v1679_v36 = vld [vmem:[%s3277_s13 + $0x78] sm:$0xff]  }
 0x304   : > { %s2281_s2 = sshll.u32 %s3753_s20, 6 }
 0x305   : > { %s1600_s6 = sadd.s32 %s2281_s2, %s2280_s1 }
 0x306   : > { %s2282_s7 = sshll.u32 %s1600_s6, 2 }
 0x307   : > { %s1602_s12 = scalar_lea.vmem %s3754_s10, %s2282_s7 }
 0x308   : > { %1620 = vst [vmem:[%s1602_s12] sm:$0xff] %v1619_v8  }
 0x309   : > { %1624 = vst [vmem:[%s1602_s12 + $0x8] sm:$0xff] %v1623_v51  }
 0x30a   : > { %1628 = vst [vmem:[%s1602_s12 + $0x10] sm:$0xff] %v1627_v27  }
 0x30b   : > { %1632 = vst [vmem:[%s1602_s12 + $0x18] sm:$0xff] %v1631_v42  }
 0x30c   : > { %1636 = vst [vmem:[%s1602_s12 + $0x20] sm:$0xff] %v1635_v54  }
 0x30d   : > { %1640 = vst [vmem:[%s1602_s12 + $0x28] sm:$0xff] %v1639_v60  }
 0x30e   : > { %1644 = vst [vmem:[%s1602_s12 + $0x30] sm:$0xff] %v1643_v38  }
 0x30f   : > { %1648 = vst [vmem:[%s1602_s12 + $0x38] sm:$0xff] %v1647_v4  }
 0x310   : > { %1652 = vst [vmem:[%s1602_s12 + $0x80] sm:$0xff] %v1651_v23  }
 0x311   : > { %1656 = vst [vmem:[%s1602_s12 + $0x88] sm:$0xff] %v1655_v45  }
 0x312   : > { %1660 = vst [vmem:[%s1602_s12 + $0x90] sm:$0xff] %v1659_v25  }
 0x313   : > { %1664 = vst [vmem:[%s1602_s12 + $0x98] sm:$0xff] %v1663_v21  }
 0x314   : > { %1668 = vst [vmem:[%s1602_s12 + $0xa0] sm:$0xff] %v1667_v32  }
 0x315   : > { %1672 = vst [vmem:[%s1602_s12 + $0xa8] sm:$0xff] %v1671_v12  }
 0x316   : > { %1676 = vst [vmem:[%s1602_s12 + $0xb0] sm:$0xff] %v1675_v40  }
 0x317   : > { %1680 = vst [vmem:[%s1602_s12 + $0xb8] sm:$0xff] %v1679_v36  }
 0x318 PF: > { %1770 = sbr.rel (!%p2825_p0) target bundleno = 818 (0x332), region = 142  ;;  %s3755_s9 = sld [smem:[#allocation15_spill]] (%p2825_p0)  ;;  %v1792_v58 = vld [vmem:[%s3296_s16] sm:$0xff] (%p2825_p0)   ;;  %v1796_v19 = vld [vmem:[%s3296_s16 + $0x8] sm:$0xff] (%p2825_p0)   ;;  %v1800_v50 = vld [vmem:[%s3296_s16 + $0x10] sm:$0xff] (%p2825_p0)  }
 0x319   : > { %s2283_s24 = sshll.u32 (%p2825_p0), %s2658_s27, 4  ;;  %s3756_s23 = sld [smem:[#allocation22_spill]] (%p2825_p0)  ;;  %v1804_v30 = vld [vmem:[%s3296_s16 + $0x18] sm:$0xff] (%p2825_p0)   ;;  %v1808_v26 = vld [vmem:[%s3296_s16 + $0x20] sm:$0xff] (%p2825_p0)   ;;  %v1812_v20 = vld [vmem:[%s3296_s16 + $0x28] sm:$0xff] (%p2825_p0)  }
 0x31a   : > { %v1816_v48 = vld [vmem:[%s3296_s16 + $0x30] sm:$0xff] (%p2825_p0)   ;;  %v1820_v1 = vld [vmem:[%s3296_s16 + $0x38] sm:$0xff] (%p2825_p0)   ;;  %v1824_v56 = vld [vmem:[%s3296_s16 + $0x40] sm:$0xff] (%p2825_p0)  }
 0x31b   : > { %v1828_v62 = vld [vmem:[%s3296_s16 + $0x48] sm:$0xff] (%p2825_p0)   ;;  %v1832_v52 = vld [vmem:[%s3296_s16 + $0x50] sm:$0xff] (%p2825_p0)   ;;  %v1836_v3 = vld [vmem:[%s3296_s16 + $0x58] sm:$0xff] (%p2825_p0)  }
 0x31c   : > { %v1840_v5 = vld [vmem:[%s3296_s16 + $0x60] sm:$0xff] (%p2825_p0)   ;;  %v1844_v44 = vld [vmem:[%s3296_s16 + $0x68] sm:$0xff] (%p2825_p0)   ;;  %v1848_v35 = vld [vmem:[%s3296_s16 + $0x70] sm:$0xff] (%p2825_p0)  }
 0x31d   : > { %v1852_v31 = vld [vmem:[%s3296_s16 + $0x78] sm:$0xff]  }
 0x31e   : > { %s2284_s14 = sshll.u32 %s3755_s9, 6 }
 0x31f   : > { %s1773_s13 = sadd.s32 %s2284_s14, %s2283_s24 }
 0x320   : > { %s2285_s15 = sshll.u32 %s1773_s13, 2 }
 0x321   : > { %s1775_s11 = scalar_lea.vmem %s3756_s23, %s2285_s15 }
 0x322   : > { %1793 = vst [vmem:[%s1775_s11] sm:$0xff] %v1792_v58  }
 0x323   : > { %1797 = vst [vmem:[%s1775_s11 + $0x8] sm:$0xff] %v1796_v19  }
 0x324   : > { %1801 = vst [vmem:[%s1775_s11 + $0x10] sm:$0xff] %v1800_v50  }
 0x325   : > { %1805 = vst [vmem:[%s1775_s11 + $0x18] sm:$0xff] %v1804_v30  }
 0x326   : > { %1809 = vst [vmem:[%s1775_s11 + $0x20] sm:$0xff] %v1808_v26  }
 0x327   : > { %1813 = vst [vmem:[%s1775_s11 + $0x28] sm:$0xff] %v1812_v20  }
 0x328   : > { %1817 = vst [vmem:[%s1775_s11 + $0x30] sm:$0xff] %v1816_v48  }
 0x329   : > { %1821 = vst [vmem:[%s1775_s11 + $0x38] sm:$0xff] %v1820_v1  }
 0x32a   : > { %1825 = vst [vmem:[%s1775_s11 + $0x80] sm:$0xff] %v1824_v56  }
 0x32b   : > { %1829 = vst [vmem:[%s1775_s11 + $0x88] sm:$0xff] %v1828_v62  }
 0x32c   : > { %1833 = vst [vmem:[%s1775_s11 + $0x90] sm:$0xff] %v1832_v52  }
 0x32d   : > { %1837 = vst [vmem:[%s1775_s11 + $0x98] sm:$0xff] %v1836_v3  }
 0x32e   : > { %1841 = vst [vmem:[%s1775_s11 + $0xa0] sm:$0xff] %v1840_v5  }
 0x32f   : > { %1845 = vst [vmem:[%s1775_s11 + $0xa8] sm:$0xff] %v1844_v44  }
 0x330   : > { %1849 = vst [vmem:[%s1775_s11 + $0xb0] sm:$0xff] %v1848_v35  }
 0x331   : > { %1853 = vst [vmem:[%s1775_s11 + $0xb8] sm:$0xff] %v1852_v31  }
 0x332 PF: > { %s23_s8 = sadd.s32 1, %s2674_s8   ;;  %s3757_s22 = sld [smem:[#allocation16_spill]] }
 0x333   : > { %p20_p1 = scmp.ge.s32.totalorder %s23_s8, 6   ;;  %s3758_s24 = smov %s2650_s25 }
 0x334   : > { %s3759_s25 = smov %s2654_s26  ;;  %s3760_s26 = smov %s2838_s3 }
 0x335   : > { %s3761_s27 = smov %s2666_s29  ;;  %s3762_s28 = smov %s2670_s30 }
 0x336   : > { %s3764_s30 = smov %s3770_s18  ;;  %22 = sbr.rel (!%p20_p1) target bundleno = 14 (0xe), region = 242 }
 0x338   : > { %s3763_s29 = smov %s3757_s22 }
 0x33b   :  { %1967 = vsyncpa [#allocation3], 1 }
 0x33c   :  { %1969 = vsyncpa [#allocation3 + $0x1], 1 }
 0x33d   :  { %1970 = vsyncpa [#allocation5], 1 }
 0x33e   :  { %1971 = vsyncpa [#allocation8], 1 }

</bundles_post_ra>
